<compile_context>
chip_gen: v7x
topology: tpu7x:2x2x1
jax: 0.10.0
libtpu: 0.0.40
codegen_flags: <defaults>
</compile_context>

<pallas_src>
import jax
import jax.numpy as jnp
from jax.experimental import pallas as pl
from jax.experimental.pallas import tpu as pltpu


# ---------------------------------------------------------------------------
# Kernels
# ---------------------------------------------------------------------------

def _epilogue(h1, w2_ref, b2_ref, w3_ref, b3_ref):
    """Shared layer-1-activation -> layer-2 -> layer-3 -> sigmoid epilogue."""
    # LeakyReLU(0.2) on the VPU.
    h1 = jnp.where(h1 >= 0.0, h1, 0.2 * h1)

    # Layer 2 on the MXU: bf16 weights upcast in-VMEM, f32 accumulate.
    h2 = jnp.dot(h1, w2_ref[...].astype(jnp.float32),
                 preferred_element_type=jnp.float32) + b2_ref[...]
    h2 = jnp.where(h2 >= 0.0, h2, 0.2 * h2)

    # Layer 3 (out_features = 1): VPU multiply + row reduce (XLU) instead of
    # an N=1 MXU matmul.  w3_ref is the (1, 256) torch-layout weight row.
    h3 = jnp.sum(h2 * w3_ref[...], axis=-1, keepdims=True) + b3_ref[...]

    # Exact sigmoid (EUP exp + exact divide): guaranteed to stay in [0, 1].
    return 1.0 / (1.0 + jnp.exp(-h3))


def _disc_kernel_single(x_ref, w1_ref, b1_ref, w2_ref, b2_ref, w3_ref, b3_ref,
                        o_ref):
    """Single-step kernel: everything resident, no accumulator / pl.when."""
    h1 = jnp.dot(x_ref[...], w1_ref[...].astype(jnp.float32),
                 preferred_element_type=jnp.float32) + b1_ref[...]
    o_ref[...] = _epilogue(h1, w2_ref, b2_ref, w3_ref, b3_ref)


def _disc_kernel_tiled(x_ref, w1_ref, b1_ref, w2_ref, b2_ref, w3_ref, b3_ref,
                       o_ref, acc_ref):
    """K-tiled layer-1 reduction (only used when F > the single-step cap)."""
    k = pl.program_id(0)

    @pl.when(k == 0)
    def _():
        acc_ref[...] = jnp.zeros_like(acc_ref)

    acc_ref[...] += jnp.dot(x_ref[...], w1_ref[...].astype(jnp.float32),
                            preferred_element_type=jnp.float32)

    @pl.when(k == pl.num_programs(0) - 1)
    def _():
        o_ref[...] = _epilogue(acc_ref[...] + b1_ref[...],
                               w2_ref, b2_ref, w3_ref, b3_ref)


# ---------------------------------------------------------------------------
# One-time parameter preparation (hoisted out of the hot path)
# ---------------------------------------------------------------------------

def prepare_params(params, *, tk=2048):
    """Transpose torch-layout (out,in) weights to (in,out), pad W1's K axis,
    cast the large streamed weights to bf16 and reshape biases / W3 to row
    vectors.  Called ONCE; the per-call wrapper does no weight work."""
    w1, b1, w2, b2, w3, b3 = params
    w1 = jnp.asarray(w1, jnp.float32).T          # (F,   512)
    w2 = jnp.asarray(w2, jnp.float32).T          # (512, 256)
    F = int(w1.shape[0])

    if F <= tk:
        f_pad = int(pl.cdiv(F, 128) * 128)       # lane alignment only
        nk, tk_eff = 1, f_pad                    # single-step kernel
    else:
        f_pad = int(pl.cdiv(F, tk) * tk)
        nk, tk_eff = f_pad // tk, tk             # K-tiled kernel
    if f_pad != F:
        w1 = jnp.pad(w1, ((0, f_pad - F), (0, 0)))

    return dict(
        w1=w1.astype(jnp.bfloat16),                        # streamed in bf16
        w2=w2.astype(jnp.bfloat16),                        # streamed in bf16
        b1=jnp.asarray(b1, jnp.float32).reshape(1, 512),
        b2=jnp.asarray(b2, jnp.float32).reshape(1, 256),
        w3t=jnp.asarray(w3, jnp.float32).reshape(1, 256),  # torch (1, 256)
        b3=jnp.asarray(b3, jnp.float32).reshape(1, 1),
        F=F, f_pad=f_pad, nk=nk, tk=tk_eff,
    )


# ---------------------------------------------------------------------------
# Forward wrapper (hot path)
# ---------------------------------------------------------------------------

def discriminator_forward(img, p):
    """img: (B, C, H, W) float32; p: prepare_params(...) output. Returns (B,)."""
    B = img.shape[0]
    x = img.reshape(B, -1).astype(jnp.float32)     # activations stay f32
    F, f_pad, nk, tk = p["F"], p["f_pad"], p["nk"], p["tk"]
    if f_pad != F:                                 # zero-pad K: no-op for matmul
        x = jnp.pad(x, ((0, 0), (0, f_pad - F)))

    operands = (x, p["w1"], p["b1"], p["w2"], p["b2"], p["w3t"], p["b3"])
    bytes_accessed = sum(int(a.size) * a.dtype.itemsize for a in operands) + B * 4
    cost = pl.CostEstimate(
        flops=2 * B * (f_pad * 512 + 512 * 256 + 256),
        transcendentals=B,
        bytes_accessed=bytes_accessed,
    )

    if nk == 1:
        # Single grid step: everything VMEM-resident (~1.6 MiB footprint).
        grid_spec = pltpu.PrefetchScalarGridSpec(
            num_scalar_prefetch=0,
            grid=(1,),
            in_specs=[
                pl.BlockSpec((B, f_pad), lambda k: (0, 0)),    # x
                pl.BlockSpec((f_pad, 512), lambda k: (0, 0)),  # W1 (bf16)
                pl.BlockSpec((1, 512), lambda k: (0, 0)),      # b1
                pl.BlockSpec((512, 256), lambda k: (0, 0)),    # W2 (bf16)
                pl.BlockSpec((1, 256), lambda k: (0, 0)),      # b2
                pl.BlockSpec((1, 256), lambda k: (0, 0)),      # W3 row
                pl.BlockSpec((1, 1), lambda k: (0, 0)),        # b3
            ],
            out_specs=pl.BlockSpec((B, 1), lambda k: (0, 0)),
        )
        kernel = _disc_kernel_single
    else:
        # Constant-block-index operands never change -> single buffer.
        const = dict(pipeline_mode=pl.Buffered(1))
        grid_spec = pltpu.PrefetchScalarGridSpec(
            num_scalar_prefetch=0,
            grid=(nk,),
            in_specs=[
                pl.BlockSpec((B, tk), lambda k: (0, k)),               # x tile
                pl.BlockSpec((tk, 512), lambda k: (k, 0)),             # W1 tile
                pl.BlockSpec((1, 512), lambda k: (0, 0), **const),     # b1
                pl.BlockSpec((512, 256), lambda k: (0, 0), **const),   # W2
                pl.BlockSpec((1, 256), lambda k: (0, 0), **const),     # b2
                pl.BlockSpec((1, 256), lambda k: (0, 0), **const),     # W3 row
                pl.BlockSpec((1, 1), lambda k: (0, 0), **const),       # b3
            ],
            out_specs=pl.BlockSpec((B, 1), lambda k: (0, 0)),
            scratch_shapes=[pltpu.VMEM((B, 512), jnp.float32)],
        )
        kernel = _disc_kernel_tiled

    out = pl.pallas_call(
        kernel,
        out_shape=jax.ShapeDtypeStruct((B, 1), jnp.float32),
        grid_spec=grid_spec,
        compiler_params=pltpu.CompilerParams(
            dimension_semantics=("arbitrary",),
        ),
        cost_estimate=cost,
    )(*operands)

    # torch: output.view(-1, 1).squeeze(1)
    return out.reshape(-1, 1).squeeze(1)


# ---------------------------------------------------------------------------
# Synthetic init (torch nn.Linear layout: W (out, in), b (out,)) + reference
# ---------------------------------------------------------------------------

def init_params(key, in_features):
    ks = jax.random.split(key, 6)
    dims = [(in_features, 512), (512, 256), (256, 1)]
    params = []
    for i, (fan_in, fan_out) in enumerate(dims):
        bound = 1.0 / (fan_in ** 0.5)
        w = jax.random.uniform(ks[2 * i], (fan_out, fan_in), jnp.float32,
                               minval=-bound, maxval=bound)
        b = jax.random.uniform(ks[2 * i + 1], (fan_out,), jnp.float32,
                               minval=-bound, maxval=bound)
        params += [w, b]
    return tuple(params)


def _reference_forward(img, params):
    """Pure-JAX f32 reference with identical semantics (torch layout)."""
    w1, b1, w2, b2, w3, b3 = params
    x = img.reshape(img.shape[0], -1)
    h1 = x @ w1.T + b1
    h1 = jnp.where(h1 >= 0.0, h1, 0.2 * h1)
    h2 = h1 @ w2.T + b2
    h2 = jnp.where(h2 >= 0.0, h2, 0.2 * h2)
    y = jax.nn.sigmoid(h2 @ w3.T + b3)
    return y.reshape(-1, 1).squeeze(1)


if __name__ == "__main__":
    key = jax.random.PRNGKey(0)
    k_img, k_par = jax.random.split(key)

    # img_shape = (C, H, W) = (4, 16, 16) -> 1024 input features, batch 2.
    B, C, H, W = 2, 4, 16, 16
    img = jax.random.normal(k_img, (B, C, H, W), dtype=jnp.float32)

    params = init_params(k_par, C * H * W)
    prepped = prepare_params(params)        # one-time, outside the hot path

    out = discriminator_forward(img, prepped)
    out = jax.block_until_ready(out)

    assert out.shape == (B,), out.shape
    assert bool(jnp.all(jnp.isfinite(out)))
    assert bool(jnp.all((out >= 0.0) & (out <= 1.0)))    # exact sigmoid range

    # Correctness vs f32 reference (bf16 weight streaming => loose tolerance).
    ref = _reference_forward(img, params)
    assert bool(jnp.all(jnp.abs(out - ref) < 5e-2)), (out, ref)

    print("KERNEL_OK")
</pallas_src>

<mosaic_0001>
module attributes {stable_mosaic.version = 11 : i64} {
  func.func @_disc_kernel_single(%arg0: i32, %arg1: memref<2x1024xf32, #tpu.memory_space<vmem>>, %arg2: memref<1024x512xbf16, #tpu.memory_space<vmem>>, %arg3: memref<1x512xf32, #tpu.memory_space<vmem>>, %arg4: memref<512x256xbf16, #tpu.memory_space<vmem>>, %arg5: memref<1x256xf32, #tpu.memory_space<vmem>>, %arg6: memref<1x256xf32, #tpu.memory_space<vmem>>, %arg7: memref<1x1xf32, #tpu.memory_space<vmem>>, %arg8: memref<2x1xf32, #tpu.memory_space<vmem>>) attributes {dimension_semantics = [#tpu.dimension_semantics<arbitrary>], iteration_bounds = array<i64: 1>, scalar_prefetch = 0 : i64, scratch_operands = 0 : i64, tpu.core_type = #tpu.core_type<tc>, window_params = [{pipeline_mode = #tpu.pipeline_mode<synchronous>, transform_indices = @transform_0, window_bounds = array<i64: 2, 1024>}, {pipeline_mode = #tpu.pipeline_mode<synchronous>, transform_indices = @transform_1, window_bounds = array<i64: 1024, 512>}, {pipeline_mode = #tpu.pipeline_mode<synchronous>, transform_indices = @transform_2, window_bounds = array<i64: 1, 512>}, {pipeline_mode = #tpu.pipeline_mode<synchronous>, transform_indices = @transform_3, window_bounds = array<i64: 512, 256>}, {pipeline_mode = #tpu.pipeline_mode<synchronous>, transform_indices = @transform_4, window_bounds = array<i64: 1, 256>}, {pipeline_mode = #tpu.pipeline_mode<synchronous>, transform_indices = @transform_5, window_bounds = array<i64: 1, 256>}, {pipeline_mode = #tpu.pipeline_mode<synchronous>, transform_indices = @transform_6, window_bounds = array<i64: 1, 1>}, {pipeline_mode = #tpu.pipeline_mode<synchronous>, transform_indices = @transform_7, window_bounds = array<i64: 2, 1>}]} {
    %c0 = arith.constant 0 : index
    %c0_0 = arith.constant 0 : index
    %0 = vector.load %arg1[%c0, %c0_0] : memref<2x1024xf32, #tpu.memory_space<vmem>>, vector<2x1024xf32>
    %c0_1 = arith.constant 0 : index
    %c0_2 = arith.constant 0 : index
    %1 = vector.load %arg2[%c0_1, %c0_2] : memref<1024x512xbf16, #tpu.memory_space<vmem>>, vector<1024x512xbf16>
    %2 = arith.extf %1 : vector<1024x512xbf16> to vector<1024x512xf32>
    %cst = arith.constant dense<0.000000e+00> : vector<2x512xf32>
    %3 = tpu.matmul %0, %2, %cst {dimension_numbers = #tpu.dot_dimension_numbers<[1], [0], [0], [1], [0, 0, 1, 1], [], []>} : vector<2x1024xf32>, vector<1024x512xf32>, vector<2x512xf32> -> vector<2x512xf32>
    %c0_3 = arith.constant 0 : index
    %c0_4 = arith.constant 0 : index
    %4 = vector.load %arg3[%c0_3, %c0_4] : memref<1x512xf32, #tpu.memory_space<vmem>>, vector<1x512xf32>
    %5 = vector.broadcast %4 : vector<1x512xf32> to vector<2x512xf32>
    %6 = arith.addf %3, %5 : vector<2x512xf32>
    %cst_5 = arith.constant 0.000000e+00 : f32
    %7 = vector.broadcast %cst_5 : f32 to vector<2x512xf32>
    %8 = arith.cmpf oge, %6, %7 : vector<2x512xf32>
    %cst_6 = arith.constant 2.000000e-01 : f32
    %9 = vector.broadcast %cst_6 : f32 to vector<2x512xf32>
    %10 = arith.mulf %9, %6 : vector<2x512xf32>
    %11 = arith.select %8, %6, %10 : vector<2x512xi1>, vector<2x512xf32>
    %c0_7 = arith.constant 0 : index
    %c0_8 = arith.constant 0 : index
    %12 = vector.load %arg4[%c0_7, %c0_8] : memref<512x256xbf16, #tpu.memory_space<vmem>>, vector<512x256xbf16>
    %13 = arith.extf %12 : vector<512x256xbf16> to vector<512x256xf32>
    %cst_9 = arith.constant dense<0.000000e+00> : vector<2x256xf32>
    %14 = tpu.matmul %11, %13, %cst_9 {dimension_numbers = #tpu.dot_dimension_numbers<[1], [0], [0], [1], [0, 0, 1, 1], [], []>} : vector<2x512xf32>, vector<512x256xf32>, vector<2x256xf32> -> vector<2x256xf32>
    %c0_10 = arith.constant 0 : index
    %c0_11 = arith.constant 0 : index
    %15 = vector.load %arg5[%c0_10, %c0_11] : memref<1x256xf32, #tpu.memory_space<vmem>>, vector<1x256xf32>
    %16 = vector.broadcast %15 : vector<1x256xf32> to vector<2x256xf32>
    %17 = arith.addf %14, %16 : vector<2x256xf32>
    %cst_12 = arith.constant 0.000000e+00 : f32
    %18 = vector.broadcast %cst_12 : f32 to vector<2x256xf32>
    %19 = arith.cmpf oge, %17, %18 : vector<2x256xf32>
    %cst_13 = arith.constant 2.000000e-01 : f32
    %20 = vector.broadcast %cst_13 : f32 to vector<2x256xf32>
    %21 = arith.mulf %20, %17 : vector<2x256xf32>
    %22 = arith.select %19, %17, %21 : vector<2x256xi1>, vector<2x256xf32>
    %c0_14 = arith.constant 0 : index
    %c0_15 = arith.constant 0 : index
    %23 = vector.load %arg6[%c0_14, %c0_15] : memref<1x256xf32, #tpu.memory_space<vmem>>, vector<1x256xf32>
    %24 = vector.broadcast %23 : vector<1x256xf32> to vector<2x256xf32>
    %25 = arith.mulf %22, %24 : vector<2x256xf32>
    %cst_16 = arith.constant dense<0.000000e+00> : vector<2xf32>
    %26 = vector.multi_reduction <add>, %25, %cst_16 [1] : vector<2x256xf32> to vector<2xf32>
    %27 = vector.shape_cast %26 : vector<2xf32> to vector<2x1xf32>
    %c0_17 = arith.constant 0 : index
    %c0_18 = arith.constant 0 : index
    %28 = vector.load %arg7[%c0_17, %c0_18] : memref<1x1xf32, #tpu.memory_space<vmem>>, vector<1x1xf32>
    %29 = vector.broadcast %28 : vector<1x1xf32> to vector<2x1xf32>
    %30 = arith.addf %27, %29 : vector<2x1xf32>
    %cst_19 = arith.constant 0.000000e+00 : f32
    %31 = vector.broadcast %cst_19 : f32 to vector<2x1xf32>
    %32 = arith.subf %31, %30 : vector<2x1xf32>
    %33 = math.exp %32 : vector<2x1xf32>
    %cst_20 = arith.constant 1.000000e+00 : f32
    %34 = vector.broadcast %cst_20 : f32 to vector<2x1xf32>
    %35 = arith.addf %34, %33 : vector<2x1xf32>
    %cst_21 = arith.constant 1.000000e+00 : f32
    %36 = vector.broadcast %cst_21 : f32 to vector<2x1xf32>
    %37 = arith.divf %36, %35 : vector<2x1xf32>
    %c0_22 = arith.constant 0 : index
    %c0_23 = arith.constant 0 : index
    %38 = vector.load %arg8[%c0_22, %c0_23] : memref<2x1xf32, #tpu.memory_space<vmem>>, vector<2x1xf32>
    tpu.vector_store %arg8[%c0_22, %c0_23], %37 {strides = array<i32>} : memref<2x1xf32, #tpu.memory_space<vmem>>, vector<2x1xf32>,
    return
  }
  func.func @transform_0(%arg0: i32) -> (i32, i32) {
    %c0_i32 = arith.constant 0 : i32
    %c0_i32_0 = arith.constant 0 : i32
    %c0_i32_1 = arith.constant 0 : i32
    return %c0_i32, %c0_i32_0 : i32, i32
  }
  func.func @transform_1(%arg0: i32) -> (i32, i32) {
    %c0_i32 = arith.constant 0 : i32
    %c0_i32_0 = arith.constant 0 : i32
    %c0_i32_1 = arith.constant 0 : i32
    return %c0_i32, %c0_i32_0 : i32, i32
  }
  func.func @transform_2(%arg0: i32) -> (i32, i32) {
    %c0_i32 = arith.constant 0 : i32
    %c0_i32_0 = arith.constant 0 : i32
    %c0_i32_1 = arith.constant 0 : i32
    return %c0_i32, %c0_i32_0 : i32, i32
  }
  func.func @transform_3(%arg0: i32) -> (i32, i32) {
    %c0_i32 = arith.constant 0 : i32
    %c0_i32_0 = arith.constant 0 : i32
    %c0_i32_1 = arith.constant 0 : i32
    return %c0_i32, %c0_i32_0 : i32, i32
  }
  func.func @transform_4(%arg0: i32) -> (i32, i32) {
    %c0_i32 = arith.constant 0 : i32
    %c0_i32_0 = arith.constant 0 : i32
    %c0_i32_1 = arith.constant 0 : i32
    return %c0_i32, %c0_i32_0 : i32, i32
  }
  func.func @transform_5(%arg0: i32) -> (i32, i32) {
    %c0_i32 = arith.constant 0 : i32
    %c0_i32_0 = arith.constant 0 : i32
    %c0_i32_1 = arith.constant 0 : i32
    return %c0_i32, %c0_i32_0 : i32, i32
  }
  func.func @transform_6(%arg0: i32) -> (i32, i32) {
    %c0_i32 = arith.constant 0 : i32
    %c0_i32_0 = arith.constant 0 : i32
    %c0_i32_1 = arith.constant 0 : i32
    return %c0_i32, %c0_i32_0 : i32, i32
  }
  func.func @transform_7(%arg0: i32) -> (i32, i32) {
    %c0_i32 = arith.constant 0 : i32
    %c0_i32_0 = arith.constant 0 : i32
    %c0_i32_1 = arith.constant 0 : i32
    return %c0_i32, %c0_i32_0 : i32, i32
  }
}

</mosaic_0001>

<bundles_post_ra>
// kernel: tpu_custom_call.1
= control target key start
LH: loop header
LB: loop body
LE: loop exit
PB: predicated region body
PF: predicated region fallthrough
CT: control target
= control target key end

     0   :  { %s3591_s0 = inlined_call_operand.hbm [shape: f32[2,1024], index: 0, kind: input, shape index: {}]   ;;  %s3592_s1 = inlined_call_operand.hbm [shape: bf16[1024,512], index: 1, kind: input, shape index: {}]   ;;  %s3593_s2 = inlined_call_operand.vmem [shape: f32[1,512], index: 2, kind: input, shape index: {}]   ;;  %s3594_s3 = inlined_call_operand.hbm [shape: bf16[512,256], index: 3, kind: input, shape index: {}]   ;;  %s3595_s4 = inlined_call_operand.vmem [shape: f32[1,256], index: 4, kind: input, shape index: {}]   ;;  %s3596_s5 = inlined_call_operand.vmem [shape: f32[1,256], index: 5, kind: input, shape index: {}]   ;;  %s3597_s6 = inlined_call_operand.<no memory space> [shape: f32[1,1], index: 6, kind: input, shape index: {}]   ;;  %s3598_s7 = inlined_call_operand.vmem [shape: f32[2,1], index: 7, kind: output, shape index: {}]  }
   0x1   :  { %v12_v0 = vstv %s3597_s6 }
   0x2   :  { %13 = vst [vmem:[#allocation2] sm:$0x1] %v12_v0 }
   0x3   :  { %14 = vsyncpa [#allocation4], 0 }
   0x4   :  { %15 = vsyncpa [#allocation6], 0  ;;  %s3422_s26 = smov [#allocation5]   ;;  %s3352_s30 = scalar_lea.hbm %s3592_s1, 32768 }
   0x5   :  { %s31_s27 = sshll.u32 %s3422_s26, 4  ;;  %p3353_p0 = scmp.ne.s32.totalorder %s3592_s1, %s3352_s30  ;;  %s32_s27 = int_to_ptr.vmem [resolvable:$true] %s31_s27 }
   0x6   :  { %p3356_p1 = scmp.lt.u32.totalorder %s3352_s30, %s3592_s1 }
   0x8   :  { %p3358_p2 = pnand %p3356_p1, %p3353_p0 }
   0xa   :  { %3361 = shalt.err (!%p3358_p2)
}
   0xb   :  { %s3362_s6 = scalar_lea.vmem %s32_s27, 32768  ;;  %p3367_p4 = scmp.lt.s32.totalorder %s32_s27, %s32_s27 }
   0xc   :  { %p3363_p3 = scmp.ne.s32.totalorder %s32_s27, %s3362_s6  ;;  %p3368_p5 = scmp.lt.s32.totalorder %s3362_s6, %s3362_s6 }
   0xe   :  { %p3369_p6 = por %p3368_p5, %p3367_p4 }
  0x10   :  { %p3370_p7 = pnand %p3369_p6, %p3363_p3 }
  0x12   :  { %3373 = shalt.err (!%p3370_p7)
}
  0x13   :  { %s3423_s12 = smov 256   ;;  %s3424_s13 = smov 16  }
  0x14   :  { %37 = dma.hbm_to_vmem [thread:$0]  %s3592_s1, 32768, %s32_s27, [#allocation6], %s3423_s12, %s3423_s12, %s3424_s13  }
  0x15   :  { %s3425_s16 = smov [#allocation3]   ;;  %s3426_s18 = smov [#allocation7]  }
  0x16   :  { %s22_s17 = sshll.u32 %s3425_s16, 4  ;;  %s45_s19 = sshll.u32 %s3426_s18, 4  ;;  %s23_s17 = int_to_ptr.vmem [resolvable:$true] %s22_s17  ;;  %s46_s19 = int_to_ptr.vmem [resolvable:$true] %s45_s19 }
  0x17   :  { %s3374_s22 = scalar_lea.hbm %s3591_s0, 256 }
  0x18   :  { %p3375_p8 = scmp.ne.s32.totalorder %s3591_s0, %s3374_s22  ;;  %p3378_p9 = scmp.lt.u32.totalorder %s3374_s22, %s3591_s0 }
  0x1a   :  { %p3380_p10 = pnand %p3378_p9, %p3375_p8 }
  0x1c   :  { %3383 = shalt.err (!%p3380_p10)
}
  0x1d   :  { %s3384_s1 = scalar_lea.vmem %s23_s17, 256  ;;  %p3389_p12 = scmp.lt.s32.totalorder %s23_s17, %s23_s17 }
  0x1e   :  { %p3385_p11 = scmp.ne.s32.totalorder %s23_s17, %s3384_s1  ;;  %p3390_p13 = scmp.lt.s32.totalorder %s3384_s1, %s3384_s1 }
  0x20   :  { %p3391_p0 = por %p3390_p13, %p3389_p12 }
  0x22   :  { %p3392_p1 = pnand %p3391_p0, %p3385_p11 }
  0x24   :  { %3395 = shalt.err (!%p3392_p1)
}
  0x25   :  { %25 = dma.hbm_to_vmem [thread:$0]  %s3591_s0, 256, %s23_s17, [#allocation4]  }
  0x26   :  { %s3396_s8 = scalar_lea.hbm %s3594_s3, 8192 }
  0x27   :  { %p3397_p2 = scmp.ne.s32.totalorder %s3594_s3, %s3396_s8  ;;  %p3400_p3 = scmp.lt.u32.totalorder %s3396_s8, %s3594_s3 }
  0x29   :  { %p3402_p4 = pnand %p3400_p3, %p3397_p2 }
  0x2b   :  { %3405 = shalt.err (!%p3402_p4)
}
  0x2c   :  { %s3406_s12 = scalar_lea.vmem %s46_s19, 8192  ;;  %p3411_p6 = scmp.lt.s32.totalorder %s46_s19, %s46_s19 }
  0x2d   :  { %p3407_p5 = scmp.ne.s32.totalorder %s46_s19, %s3406_s12  ;;  %p3412_p7 = scmp.lt.s32.totalorder %s3406_s12, %s3406_s12 }
  0x2f   :  { %p3413_p8 = por %p3412_p7, %p3411_p6 }
  0x31   :  { %p3414_p9 = pnand %p3413_p8, %p3407_p5 }
  0x33   :  { %3417 = shalt.err (!%p3414_p9)
}
  0x34   :  { %s3427_s0 = smov 128   ;;  %s3428_s13 = smov 8  }
  0x35   :  { %51 = dma.hbm_to_vmem [thread:$0]  %s3594_s3, 8192, %s46_s19, [#allocation6], %s3427_s0, %s3427_s0, %s3428_s13  }
  0x36   :  { %3418 = dma.done.wait [#allocation4], 256  }
  0x37   :  { %3419 = vsyncadd [#allocation4], 4294967040 }
  0x38   :  { %3420 = dma.done.wait [#allocation6], 40960  }
  0x39   :  { %3421 = vsyncadd [#allocation6], 4294926336  ;;  %v2866_v1 = vld [vmem:[#allocation5 + $0x4] ss:$16 sps:$4 sm:$0xff]   ;;  %v2870_v3 = vld [vmem:[#allocation5] ss:$16 sps:$4 sm:$0xff]   ;;  %v839_v37 = vlaneseq }
  0x3a   :  { %v2868_v2 = vld [vmem:[#allocation5 + $0x204] ss:$16 sps:$4 sm:$0xff]   ;;  %1879 = vmatprep.subr.bf16.mxu1 %v2866_v1  ;;  %v2871_v4 = vld [vmem:[#allocation5 + $0x200] ss:$16 sps:$4 sm:$0xff]   ;;  %v3429_v38 = vmov 1983009808  }
  0x3b   :  { %1943 = vmatprep.subr.bf16.mxu0 %v2868_v2  ;;  %v2872_v5 = vld [vmem:[#allocation5 + $0x24] ss:$16 sps:$4 sm:$0xff]   ;;  %1881 = vmatpush1.bf16.msra.mxu1 %v2870_v3  ;;  %v2876_v7 = vld [vmem:[#allocation5 + $0x20] ss:$16 sps:$4 sm:$0xff]   ;;  %v863_v39 = vunpack.c.l.s4 %v3429_v38  ;;  %v3509_v43 = vshrl.u32 %v839_v37, 7  ;;  %vm1849_vm6 = vcmask 1041408  }
  0x3c   :  { %1945 = vmatpush1.bf16.msra.mxu0 %v2871_v4  ;;  %v2874_v6 = vld [vmem:[#allocation5 + $0x224] ss:$16 sps:$4 sm:$0xff]   ;;  %1883 = vmatprep.subr.bf16.mxu1 %v2872_v5  ;;  %v2877_v8 = vld [vmem:[#allocation5 + $0x220] ss:$16 sps:$4 sm:$0xff]   ;;  %v3002_v38 = vld [vmem:[#allocation5 + $0xcc] ss:$16 sps:$4 sm:$0xff]  }
  0x3d   :  { %1947 = vmatprep.subr.bf16.mxu0 %v2874_v6  ;;  %v2878_v9 = vld [vmem:[#allocation5 + $0x44] ss:$16 sps:$4 sm:$0xff]   ;;  %v2882_v11 = vld [vmem:[#allocation5 + $0x40] ss:$16 sps:$4 sm:$0xff]   ;;  %v864_v44 = vunpack.c.0.s8 %v863_v39  ;;  %v3529_v39 = vld [vmem:[#allocation3 + $0x8] sm:$0xff]  ;;  %vm1869_vm7 = vcmask 1024  }
  0x3e   :  { %v2880_v10 = vld [vmem:[#allocation5 + $0x244] ss:$16 sps:$4 sm:$0xff]   ;;  %v2883_v12 = vld [vmem:[#allocation5 + $0x240] ss:$16 sps:$4 sm:$0xff]  }
  0x3f   :  { %1885 = vmatpush1.bf16.msra.mxu1 %v2876_v7  ;;  %v2884_v13 = vld [vmem:[#allocation5 + $0x64] ss:$16 sps:$4 sm:$0xff]   ;;  %v2888_v15 = vld [vmem:[#allocation5 + $0x60] ss:$16 sps:$4 sm:$0xff]   ;;  %v3512_v50 = vsub.s32 %v864_v44, %v3509_v43 }
  0x40   :  { %1949 = vmatpush1.bf16.msra.mxu0 %v2877_v8  ;;  %1887 = vmatprep.subr.bf16.mxu1 %v2878_v9  ;;  %v2886_v14 = vld [vmem:[#allocation5 + $0x264] ss:$16 sps:$4 sm:$0xff]   ;;  %v2889_v16 = vld [vmem:[#allocation5 + $0x260] ss:$16 sps:$4 sm:$0xff]  }
  0x41   :  { %1951 = vmatprep.subr.bf16.mxu0 %v2880_v10  ;;  %v2890_v17 = vld [vmem:[#allocation5 + $0x84] ss:$16 sps:$4 sm:$0xff]   ;;  %v2894_v19 = vld [vmem:[#allocation5 + $0x80] ss:$16 sps:$4 sm:$0xff]  }
  0x42   :  { %v2892_v18 = vld [vmem:[#allocation5 + $0x284] ss:$16 sps:$4 sm:$0xff]   ;;  %v2895_v20 = vld [vmem:[#allocation5 + $0x280] ss:$16 sps:$4 sm:$0xff]  }
  0x43   :  { %1889 = vmatpush1.bf16.msra.mxu1 %v2882_v11  ;;  %v2896_v21 = vld [vmem:[#allocation5 + $0xa4] ss:$16 sps:$4 sm:$0xff]   ;;  %v2900_v23 = vld [vmem:[#allocation5 + $0xa0] ss:$16 sps:$4 sm:$0xff]  }
  0x44   :  { %1953 = vmatpush1.bf16.msra.mxu0 %v2883_v12  ;;  %1891 = vmatprep.subr.bf16.mxu1 %v2884_v13  ;;  %v2898_v22 = vld [vmem:[#allocation5 + $0x2a4] ss:$16 sps:$4 sm:$0xff]   ;;  %v2901_v24 = vld [vmem:[#allocation5 + $0x2a0] ss:$16 sps:$4 sm:$0xff]  }
  0x45   :  { %1955 = vmatprep.subr.bf16.mxu0 %v2886_v14  ;;  %v2902_v25 = vld [vmem:[#allocation5 + $0xc4] ss:$16 sps:$4 sm:$0xff]   ;;  %v2906_v27 = vld [vmem:[#allocation5 + $0xc0] ss:$16 sps:$4 sm:$0xff]   ;;  %v2966_v14 = vld [vmem:[#allocation5 + $0xc] ss:$16 sps:$4 sm:$0xff]  }
  0x46   :  { %v2904_v26 = vld [vmem:[#allocation5 + $0x2c4] ss:$16 sps:$4 sm:$0xff]   ;;  %v2907_v28 = vld [vmem:[#allocation5 + $0x2c0] ss:$16 sps:$4 sm:$0xff]  }
  0x47   :  { %1893 = vmatpush1.bf16.msra.mxu1 %v2888_v15  ;;  %v2908_v29 = vld [vmem:[#allocation5 + $0xe4] ss:$16 sps:$4 sm:$0xff]   ;;  %v2912_v31 = vld [vmem:[#allocation5 + $0xe0] ss:$16 sps:$4 sm:$0xff]  }
  0x48   :  { %1957 = vmatpush1.bf16.msra.mxu0 %v2889_v16  ;;  %1895 = vmatprep.subr.bf16.mxu1 %v2890_v17  ;;  %v2910_v30 = vld [vmem:[#allocation5 + $0x2e4] ss:$16 sps:$4 sm:$0xff]   ;;  %v2913_v32 = vld [vmem:[#allocation5 + $0x2e0] ss:$16 sps:$4 sm:$0xff]   ;;  %v2968_v16 = vld [vmem:[#allocation5 + $0x8] ss:$16 sps:$4 sm:$0xff]  }
  0x49   :  { %1959 = vmatprep.subr.bf16.mxu0 %v2892_v18  ;;  %v2914_v33 = vld [vmem:[#allocation5 + $0x104] ss:$16 sps:$4 sm:$0xff]   ;;  %v2918_v35 = vld [vmem:[#allocation5 + $0x100] ss:$16 sps:$4 sm:$0xff]   ;;  %v2972_v18 = vld [vmem:[#allocation5 + $0x2c] ss:$16 sps:$4 sm:$0xff]  }
  0x4a   :  { %v2916_v34 = vld [vmem:[#allocation5 + $0x304] ss:$16 sps:$4 sm:$0xff]   ;;  %v2919_v36 = vld [vmem:[#allocation5 + $0x300] ss:$16 sps:$4 sm:$0xff]  }
  0x4b   :  { %1897 = vmatpush1.bf16.msra.mxu1 %v2894_v19  ;;  %v2920_v40 = vld [vmem:[#allocation5 + $0x124] ss:$16 sps:$4 sm:$0xff]   ;;  %v2924_v42 = vld [vmem:[#allocation5 + $0x120] ss:$16 sps:$4 sm:$0xff]  }
  0x4c   :  { %1961 = vmatpush1.bf16.msra.mxu0 %v2895_v20  ;;  %1899 = vmatprep.subr.bf16.mxu1 %v2896_v21  ;;  %v2922_v41 = vld [vmem:[#allocation5 + $0x324] ss:$16 sps:$4 sm:$0xff]   ;;  %v2925_v45 = vld [vmem:[#allocation5 + $0x320] ss:$16 sps:$4 sm:$0xff]   ;;  %v2974_v20 = vld [vmem:[#allocation5 + $0x28] ss:$16 sps:$4 sm:$0xff]  }
  0x4d   :  { %1963 = vmatprep.subr.bf16.mxu0 %v2898_v22  ;;  %v2926_v46 = vld [vmem:[#allocation5 + $0x144] ss:$16 sps:$4 sm:$0xff]   ;;  %v2930_v48 = vld [vmem:[#allocation5 + $0x140] ss:$16 sps:$4 sm:$0xff]   ;;  %v2978_v22 = vld [vmem:[#allocation5 + $0x4c] ss:$16 sps:$4 sm:$0xff]  }
  0x4e   :  { %v2928_v47 = vld [vmem:[#allocation5 + $0x344] ss:$16 sps:$4 sm:$0xff]   ;;  %v2931_v49 = vld [vmem:[#allocation5 + $0x340] ss:$16 sps:$4 sm:$0xff]  }
  0x4f   :  { %1901 = vmatpush1.bf16.msra.mxu1 %v2900_v23  ;;  %v2932_v51 = vld [vmem:[#allocation5 + $0x164] ss:$16 sps:$4 sm:$0xff]   ;;  %v2936_v54 = vld [vmem:[#allocation5 + $0x160] ss:$16 sps:$4 sm:$0xff]  }
  0x50   :  { %1965 = vmatpush1.bf16.msra.mxu0 %v2901_v24  ;;  %1903 = vmatprep.subr.bf16.mxu1 %v2902_v25  ;;  %v2934_v52 = vld [vmem:[#allocation5 + $0x364] ss:$16 sps:$4 sm:$0xff]   ;;  %v2937_v57 = vld [vmem:[#allocation5 + $0x360] ss:$16 sps:$4 sm:$0xff]   ;;  %v2980_v24 = vld [vmem:[#allocation5 + $0x48] ss:$16 sps:$4 sm:$0xff]  }
  0x51   :  { %1967 = vmatprep.subr.bf16.mxu0 %v2904_v26  ;;  %v67_v53 = vld [vmem:[#allocation3] sm:$0xff]  ;;  %v2984_v26 = vld [vmem:[#allocation5 + $0x6c] ss:$16 sps:$4 sm:$0xff]  }
  0x52   :  { %v3515_v55 = vrot.slane %v67_v53, %v3512_v50  ;;  %v861_v56 = vcombine.high %v67_v53, %v67_v53  ;;  %v2938_v58 = vld [vmem:[#allocation5 + $0x184] ss:$16 sps:$4 sm:$0xff]   ;;  %v2942_v62 = vld [vmem:[#allocation5 + $0x180] ss:$16 sps:$4 sm:$0xff]   ;;  %v3016_v53 = vld [vmem:[#allocation5 + $0x108] ss:$16 sps:$4 sm:$0xff]  }
  0x53   :  { %1905 = vmatpush1.bf16.msra.mxu1 %v2906_v27  ;;  %v2940_v59 = vld [vmem:[#allocation5 + $0x384] ss:$16 sps:$4 sm:$0xff]   ;;  %v2943_v0 = vld [vmem:[#allocation5 + $0x380] ss:$16 sps:$4 sm:$0xff]  }
  0x54   :  { %1969 = vmatpush1.bf16.msra.mxu0 %v2907_v28  ;;  %1907 = vmatprep.subr.bf16.mxu1 %v2908_v29  ;;  %v876_v60 = vcombine.high %v3515_v55, %v3515_v55  ;;  %v3520_v61 = vrot.slane %v861_v56, %v3512_v50  ;;  %v2944_v1 = vld [vmem:[#allocation5 + $0x1a4] ss:$16 sps:$4 sm:$0xff]   ;;  %v2948_v3 = vld [vmem:[#allocation5 + $0x1a0] ss:$16 sps:$4 sm:$0xff]   ;;  %v2986_v28 = vld [vmem:[#allocation5 + $0x68] ss:$16 sps:$4 sm:$0xff]  }
  0x55   :  { %1971 = vmatprep.subr.bf16.mxu0 %v2910_v30  ;;  %v2946_v2 = vld [vmem:[#allocation5 + $0x3a4] ss:$16 sps:$4 sm:$0xff]   ;;  %v2949_v4 = vld [vmem:[#allocation5 + $0x3a0] ss:$16 sps:$4 sm:$0xff]   ;;  %v2990_v30 = vld [vmem:[#allocation5 + $0x8c] ss:$16 sps:$4 sm:$0xff]  }
  0x56   :  { %967 = vmatprep.mubr.f32.mxu1 %v876_v60  ;;  %v3524_v63 = vcombine.high %v3520_v61, %v3520_v61  ;;  %v2950_v5 = vld [vmem:[#allocation5 + $0x1c4] ss:$16 sps:$4 sm:$0xff]   ;;  %v2954_v7 = vld [vmem:[#allocation5 + $0x1c0] ss:$16 sps:$4 sm:$0xff]   ;;  %v3020_v56 = vld [vmem:[#allocation5 + $0x12c] ss:$16 sps:$4 sm:$0xff]  }
  0x57   :  { %1909 = vmatpush1.bf16.msra.mxu1 %v2912_v31  ;;  %v2952_v6 = vld [vmem:[#allocation5 + $0x3c4] ss:$16 sps:$4 sm:$0xff]   ;;  %v2955_v8 = vld [vmem:[#allocation5 + $0x3c0] ss:$16 sps:$4 sm:$0xff]  }
  0x58   :  { %1973 = vmatpush1.bf16.msra.mxu0 %v2913_v32  ;;  %1911 = vmatprep.subr.bf16.mxu1 %v2914_v33  ;;  %v2956_v9 = vld [vmem:[#allocation5 + $0x1e4] ss:$16 sps:$4 sm:$0xff]   ;;  %v2960_v11 = vld [vmem:[#allocation5 + $0x1e0] ss:$16 sps:$4 sm:$0xff]   ;;  %v2992_v32 = vld [vmem:[#allocation5 + $0x88] ss:$16 sps:$4 sm:$0xff]  }
  0x59   :  { %1975 = vmatprep.subr.bf16.mxu0 %v2916_v34  ;;  %1038 = vmatprep.mubr.f32.mxu0 %v3524_v63  ;;  %v2958_v10 = vld [vmem:[#allocation5 + $0x3e4] ss:$16 sps:$4 sm:$0xff]   ;;  %v2961_v12 = vld [vmem:[#allocation5 + $0x3e0] ss:$16 sps:$4 sm:$0xff]   ;;  %v2996_v34 = vld [vmem:[#allocation5 + $0xac] ss:$16 sps:$4 sm:$0xff]  }
  0x5a   :  { %v2963_v13 = vld [vmem:[#allocation5 + $0x404] ss:$16 sps:$4 sm:$0xff]   ;;  %v2965_v15 = vld [vmem:[#allocation5 + $0x400] ss:$16 sps:$4 sm:$0xff]  }
  0x5b   :  { %1913 = vmatpush1.bf16.msra.mxu1 %v2918_v35  ;;  %v2969_v17 = vld [vmem:[#allocation5 + $0x424] ss:$16 sps:$4 sm:$0xff]   ;;  %v2971_v19 = vld [vmem:[#allocation5 + $0x420] ss:$16 sps:$4 sm:$0xff]  }
  0x5c   :  { %1977 = vmatpush1.bf16.msra.mxu0 %v2919_v36  ;;  %1915 = vmatprep.subr.bf16.mxu1 %v2920_v40  ;;  %v2975_v21 = vld [vmem:[#allocation5 + $0x444] ss:$16 sps:$4 sm:$0xff]   ;;  %v2977_v23 = vld [vmem:[#allocation5 + $0x440] ss:$16 sps:$4 sm:$0xff]   ;;  %v2998_v36 = vld [vmem:[#allocation5 + $0xa8] ss:$16 sps:$4 sm:$0xff]   ;;  %v3533_v40 = vrot.slane %v3529_v39, %v3512_v50 }
  0x5d   :  { %1979 = vmatprep.subr.bf16.mxu0 %v2922_v41  ;;  %v2981_v25 = vld [vmem:[#allocation5 + $0x464] ss:$16 sps:$4 sm:$0xff]   ;;  %v2983_v27 = vld [vmem:[#allocation5 + $0x460] ss:$16 sps:$4 sm:$0xff]  }
  0x5e   :  { %v2987_v29 = vld [vmem:[#allocation5 + $0x484] ss:$16 sps:$4 sm:$0xff]   ;;  %v2989_v31 = vld [vmem:[#allocation5 + $0x480] ss:$16 sps:$4 sm:$0xff]   ;;  %v3537_v44 = vcombine.high %v3533_v40, %v3533_v40 }
  0x5f   :  { %1917 = vmatpush1.bf16.msra.mxu1 %v2924_v42  ;;  %v2993_v33 = vld [vmem:[#allocation5 + $0x4a4] ss:$16 sps:$4 sm:$0xff]   ;;  %v2995_v35 = vld [vmem:[#allocation5 + $0x4a0] ss:$16 sps:$4 sm:$0xff]   ;;  %v3004_v42 = vld [vmem:[#allocation5 + $0xc8] ss:$16 sps:$4 sm:$0xff]  }
  0x60   :  { %1981 = vmatpush1.bf16.msra.mxu0 %v2925_v45  ;;  %1919 = vmatprep.subr.bf16.mxu1 %v2926_v46  ;;  %v2999_v37 = vld [vmem:[#allocation5 + $0x4c4] ss:$16 sps:$4 sm:$0xff]   ;;  %v3001_v41 = vld [vmem:[#allocation5 + $0x4c0] ss:$16 sps:$4 sm:$0xff]   ;;  %v3008_v46 = vld [vmem:[#allocation5 + $0xec] ss:$16 sps:$4 sm:$0xff]  }
  0x61   :  { %1983 = vmatprep.subr.bf16.mxu0 %v2928_v47  ;;  %v3005_v45 = vld [vmem:[#allocation5 + $0x4e4] ss:$16 sps:$4 sm:$0xff]   ;;  %v3007_v47 = vld [vmem:[#allocation5 + $0x4e0] ss:$16 sps:$4 sm:$0xff]  }
  0x63   :  { %1921 = vmatpush1.bf16.msra.mxu1 %v2930_v48  ;;  %v3010_v48 = vld [vmem:[#allocation5 + $0xe8] ss:$16 sps:$4 sm:$0xff]  }
  0x64   :  { %1985 = vmatpush1.bf16.msra.mxu0 %v2931_v49  ;;  %1923 = vmatprep.subr.bf16.mxu1 %v2932_v51  ;;  %v3011_v49 = vld [vmem:[#allocation5 + $0x504] ss:$16 sps:$4 sm:$0xff]   ;;  %v3014_v51 = vld [vmem:[#allocation5 + $0x10c] ss:$16 sps:$4 sm:$0xff]  }
  0x65   :  { %1987 = vmatprep.subr.bf16.mxu0 %v2934_v52  ;;  %v3013_v52 = vld [vmem:[#allocation5 + $0x500] ss:$16 sps:$4 sm:$0xff]  }
  0x67   :  { %1925 = vmatpush1.bf16.msra.mxu1 %v2936_v54  ;;  %v3017_v54 = vld [vmem:[#allocation5 + $0x524] ss:$16 sps:$4 sm:$0xff]  }
  0x68   :  { %1989 = vmatpush1.bf16.msra.mxu0 %v2937_v57  ;;  %1927 = vmatprep.subr.bf16.mxu1 %v2938_v58  ;;  %v3019_v57 = vld [vmem:[#allocation5 + $0x520] ss:$16 sps:$4 sm:$0xff]   ;;  %v3022_v58 = vld [vmem:[#allocation5 + $0x128] ss:$16 sps:$4 sm:$0xff]  }
  0x69   :  { %1991 = vmatprep.subr.bf16.mxu0 %v2940_v59  ;;  %v3023_v59 = vld [vmem:[#allocation5 + $0x544] ss:$16 sps:$4 sm:$0xff]  }
  0x6b   :  { %1929 = vmatpush1.bf16.msra.mxu1 %v2942_v62  ;;  %v3025_v62 = vld [vmem:[#allocation5 + $0x540] ss:$16 sps:$4 sm:$0xff]  }
  0x6c   :  { %1993 = vmatpush1.bf16.msra.mxu0 %v2943_v0  ;;  %1931 = vmatprep.subr.bf16.mxu1 %v2944_v1  ;;  %v3028_v0 = vld [vmem:[#allocation5 + $0x148] ss:$16 sps:$4 sm:$0xff]   ;;  %v3029_v1 = vld [vmem:[#allocation5 + $0x564] ss:$16 sps:$4 sm:$0xff]  }
  0x6d   :  { %1995 = vmatprep.subr.bf16.mxu0 %v2946_v2  ;;  %v3032_v2 = vld [vmem:[#allocation5 + $0x16c] ss:$16 sps:$4 sm:$0xff]  }
  0x6f   :  { %1933 = vmatpush1.bf16.msra.mxu1 %v2948_v3  ;;  %v3031_v3 = vld [vmem:[#allocation5 + $0x560] ss:$16 sps:$4 sm:$0xff]  }
  0x70   :  { %1997 = vmatpush1.bf16.msra.mxu0 %v2949_v4  ;;  %1935 = vmatprep.subr.bf16.mxu1 %v2950_v5  ;;  %v3034_v4 = vld [vmem:[#allocation5 + $0x168] ss:$16 sps:$4 sm:$0xff]   ;;  %v3035_v5 = vld [vmem:[#allocation5 + $0x584] ss:$16 sps:$4 sm:$0xff]  }
  0x71   :  { %1999 = vmatprep.subr.bf16.mxu0 %v2952_v6  ;;  %v3038_v6 = vld [vmem:[#allocation5 + $0x18c] ss:$16 sps:$4 sm:$0xff]  }
  0x73   :  { %1937 = vmatpush1.bf16.msra.mxu1 %v2954_v7  ;;  %v3037_v7 = vld [vmem:[#allocation5 + $0x580] ss:$16 sps:$4 sm:$0xff]  }
  0x74   :  { %2001 = vmatpush1.bf16.msra.mxu0 %v2955_v8  ;;  %1939 = vmatprep.subr.bf16.mxu1 %v2956_v9  ;;  %v3040_v8 = vld [vmem:[#allocation5 + $0x188] ss:$16 sps:$4 sm:$0xff]   ;;  %v3041_v9 = vld [vmem:[#allocation5 + $0x5a4] ss:$16 sps:$4 sm:$0xff]  }
  0x75   :  { %2003 = vmatprep.subr.bf16.mxu0 %v2958_v10  ;;  %v3044_v10 = vld [vmem:[#allocation5 + $0x1ac] ss:$16 sps:$4 sm:$0xff]  }
  0x77   :  { %1941 = vmatpush1.bf16.msra.mxu1 %v2960_v11  ;;  %v3043_v11 = vld [vmem:[#allocation5 + $0x5a0] ss:$16 sps:$4 sm:$0xff]  }
  0x78   :  { %2005 = vmatpush1.bf16.msra.mxu0 %v2961_v12  ;;  %2135 = vmatprep.subr.bf16.mxu1 %v2966_v14  ;;  %v3046_v12 = vld [vmem:[#allocation5 + $0x1a8] ss:$16 sps:$4 sm:$0xff]   ;;  %v3050_v14 = vld [vmem:[#allocation5 + $0x1cc] ss:$16 sps:$4 sm:$0xff]  }
  0x79   :  { %2007 = vmatprep.subr.bf16.mxu0 %v2963_v13  ;;  %v3047_v13 = vld [vmem:[#allocation5 + $0x5c4] ss:$16 sps:$4 sm:$0xff]  }
  0x7a   :  { %968 = vmatmul.mubr.f32.vlgmr.msra.gmra.mrb[0].mxu1 %v3515_v55 }
  0x7b   :  { %1039 = vmatmul.mubr.f32.vlgmr.msra.gmra.mrb[0].mxu0 %v3520_v61  ;;  %2137 = vmatpush1.bf16.msra.mxu1 %v2968_v16  ;;  %v3052_v16 = vld [vmem:[#allocation5 + $0x1c8] ss:$16 sps:$4 sm:$0xff]  }
  0x7c   :  { %2009 = vmatpush1.bf16.msra.mxu0 %v2965_v15  ;;  %2139 = vmatprep.subr.bf16.mxu1 %v2972_v18  ;;  %v3049_v15 = vld [vmem:[#allocation5 + $0x5c0] ss:$16 sps:$4 sm:$0xff]   ;;  %v3056_v18 = vld [vmem:[#allocation5 + $0x1ec] ss:$16 sps:$4 sm:$0xff]  }
  0x7d   :  { %2011 = vmatprep.subr.bf16.mxu0 %v2969_v17  ;;  %1251 = vmatprep.mubr.f32.mxu1 %v876_v60  ;;  %v3026_v60 = vld [vmem:[#allocation5 + $0x14c] ss:$16 sps:$4 sm:$0xff]   ;;  %v3053_v17 = vld [vmem:[#allocation5 + $0x5e4] ss:$16 sps:$4 sm:$0xff]  }
  0x7e   :  { %1109 = vmatprep.mubr.f32.mxu0 %v3537_v44 }
  0x7f   :  { %2141 = vmatpush1.bf16.msra.mxu1 %v2974_v20  ;;  %v3055_v20 = vld [vmem:[#allocation5 + $0x5e0] ss:$16 sps:$4 sm:$0xff]  }
  0x80   :  { %2013 = vmatpush1.bf16.msra.mxu0 %v2971_v19  ;;  %2143 = vmatprep.subr.bf16.mxu1 %v2978_v22  ;;  %v878_v19 = vcombine.high %v3529_v39, %v3529_v39  ;;  %v3059_v22 = vld [vmem:[#allocation5 + $0x604] ss:$16 sps:$4 sm:$0xff]   ;;  %v3086_v39 = vld [vmem:[#allocation5 + $0x28c] ss:$16 sps:$4 sm:$0xff]  }
  0x81   :  { %2015 = vmatprep.subr.bf16.mxu0 %v2975_v21  ;;  %v3058_v21 = vld [vmem:[#allocation5 + $0x1e8] ss:$16 sps:$4 sm:$0xff]  }
  0x83   :  { %2145 = vmatpush1.bf16.msra.mxu1 %v2980_v24  ;;  %v3543_v24 = vrot.slane %v878_v19, %v3512_v50  ;;  %v3067_v50 = vld [vmem:[#allocation5 + $0x620] ss:$16 sps:$4 sm:$0xff]   ;;  %v3142_v19 = vld [vmem:[#allocation5 + $0x3a8] ss:$16 sps:$4 sm:$0xff]  }
  0x84   :  { %2017 = vmatpush1.bf16.msra.mxu0 %v2977_v23  ;;  %2147 = vmatprep.subr.bf16.mxu1 %v2984_v26  ;;  %v3062_v23 = vld [vmem:[#allocation5 + $0x20c] ss:$16 sps:$4 sm:$0xff]   ;;  %v3064_v26 = vld [vmem:[#allocation5 + $0x208] ss:$16 sps:$4 sm:$0xff]  }
  0x85   :  { %2019 = vmatprep.subr.bf16.mxu0 %v2981_v25  ;;  %v3061_v25 = vld [vmem:[#allocation5 + $0x600] ss:$16 sps:$4 sm:$0xff]  }
  0x87   :  { %2149 = vmatpush1.bf16.msra.mxu1 %v2986_v28  ;;  %v3068_v28 = vld [vmem:[#allocation5 + $0x22c] ss:$16 sps:$4 sm:$0xff]  }
  0x88   :  { %2021 = vmatpush1.bf16.msra.mxu0 %v2983_v27  ;;  %2151 = vmatprep.subr.bf16.mxu1 %v2990_v30  ;;  %v3065_v27 = vld [vmem:[#allocation5 + $0x624] ss:$16 sps:$4 sm:$0xff]   ;;  %v3070_v30 = vld [vmem:[#allocation5 + $0x228] ss:$16 sps:$4 sm:$0xff]  }
  0x89   :  { %2023 = vmatprep.subr.bf16.mxu0 %v2987_v29  ;;  %v3547_v29 = vcombine.high %v3543_v24, %v3543_v24 }
  0x8b   :  { %2153 = vmatpush1.bf16.msra.mxu1 %v2992_v32  ;;  %v3074_v32 = vld [vmem:[#allocation5 + $0x24c] ss:$16 sps:$4 sm:$0xff]  }
  0x8c   :  { %2025 = vmatpush1.bf16.msra.mxu0 %v2989_v31  ;;  %2155 = vmatprep.subr.bf16.mxu1 %v2996_v34  ;;  %v3071_v31 = vld [vmem:[#allocation5 + $0x644] ss:$16 sps:$4 sm:$0xff]   ;;  %v3076_v34 = vld [vmem:[#allocation5 + $0x248] ss:$16 sps:$4 sm:$0xff]  }
  0x8d   :  { %2027 = vmatprep.subr.bf16.mxu0 %v2993_v33  ;;  %v3073_v33 = vld [vmem:[#allocation5 + $0x640] ss:$16 sps:$4 sm:$0xff]  }
  0x8f   :  { %2157 = vmatpush1.bf16.msra.mxu1 %v2998_v36  ;;  %v3079_v36 = vld [vmem:[#allocation5 + $0x660] ss:$16 sps:$4 sm:$0xff]  }
  0x90   :  { %2029 = vmatpush1.bf16.msra.mxu0 %v2995_v35  ;;  %2159 = vmatprep.subr.bf16.mxu1 %v3002_v38  ;;  %v3077_v35 = vld [vmem:[#allocation5 + $0x664] ss:$16 sps:$4 sm:$0xff]  }
  0x91   :  { %2031 = vmatprep.subr.bf16.mxu0 %v2999_v37  ;;  %v3082_v37 = vld [vmem:[#allocation5 + $0x268] ss:$16 sps:$4 sm:$0xff]   ;;  %v3083_v38 = vld [vmem:[#allocation5 + $0x684] ss:$16 sps:$4 sm:$0xff]  }
  0x93   :  { %2161 = vmatpush1.bf16.msra.mxu1 %v3004_v42  ;;  %v3089_v42 = vld [vmem:[#allocation5 + $0x6a4] ss:$16 sps:$4 sm:$0xff]  }
  0x94   :  { %2033 = vmatpush1.bf16.msra.mxu0 %v3001_v41  ;;  %2163 = vmatprep.subr.bf16.mxu1 %v3008_v46  ;;  %v3085_v41 = vld [vmem:[#allocation5 + $0x680] ss:$16 sps:$4 sm:$0xff]  }
  0x95   :  { %2035 = vmatprep.subr.bf16.mxu0 %v3005_v45  ;;  %v3092_v45 = vld [vmem:[#allocation5 + $0x2ac] ss:$16 sps:$4 sm:$0xff]   ;;  %v3091_v46 = vld [vmem:[#allocation5 + $0x6a0] ss:$16 sps:$4 sm:$0xff]  }
  0x97   :  { %2165 = vmatpush1.bf16.msra.mxu1 %v3010_v48  ;;  %v3095_v48 = vld [vmem:[#allocation5 + $0x6c4] ss:$16 sps:$4 sm:$0xff]  }
  0x98   :  { %2037 = vmatpush1.bf16.msra.mxu0 %v3007_v47  ;;  %2167 = vmatprep.subr.bf16.mxu1 %v3014_v51  ;;  %v3094_v47 = vld [vmem:[#allocation5 + $0x2a8] ss:$16 sps:$4 sm:$0xff]   ;;  %v3097_v51 = vld [vmem:[#allocation5 + $0x6c0] ss:$16 sps:$4 sm:$0xff]  }
  0x99   :  { %2039 = vmatprep.subr.bf16.mxu0 %v3011_v49  ;;  %v3098_v49 = vld [vmem:[#allocation5 + $0x2cc] ss:$16 sps:$4 sm:$0xff]  }
  0x9b   :  { %2169 = vmatpush1.bf16.msra.mxu1 %v3016_v53  ;;  %v3101_v53 = vld [vmem:[#allocation5 + $0x6e4] ss:$16 sps:$4 sm:$0xff]  }
  0x9c   :  { %2041 = vmatpush1.bf16.msra.mxu0 %v3013_v52  ;;  %2171 = vmatprep.subr.bf16.mxu1 %v3020_v56  ;;  %v3100_v52 = vld [vmem:[#allocation5 + $0x2c8] ss:$16 sps:$4 sm:$0xff]   ;;  %v3103_v56 = vld [vmem:[#allocation5 + $0x6e0] ss:$16 sps:$4 sm:$0xff]  }
  0x9d   :  { %2043 = vmatprep.subr.bf16.mxu0 %v3017_v54  ;;  %v3104_v54 = vld [vmem:[#allocation5 + $0x2ec] ss:$16 sps:$4 sm:$0xff]  }
  0x9f   :  { %2173 = vmatpush1.bf16.msra.mxu1 %v3022_v58  ;;  %v3107_v58 = vld [vmem:[#allocation5 + $0x704] ss:$16 sps:$4 sm:$0xff]  }
  0xa0   :  { %2045 = vmatpush1.bf16.msra.mxu0 %v3019_v57  ;;  %2175 = vmatprep.subr.bf16.mxu1 %v3026_v60  ;;  %v3106_v57 = vld [vmem:[#allocation5 + $0x2e8] ss:$16 sps:$4 sm:$0xff]   ;;  %v3109_v60 = vld [vmem:[#allocation5 + $0x700] ss:$16 sps:$4 sm:$0xff]  }
  0xa1   :  { %2047 = vmatprep.subr.bf16.mxu0 %v3023_v59  ;;  %v3110_v59 = vld [vmem:[#allocation5 + $0x30c] ss:$16 sps:$4 sm:$0xff]  }
  0xa3   :  { %2177 = vmatpush1.bf16.msra.mxu1 %v3028_v0  ;;  %v3113_v0 = vld [vmem:[#allocation5 + $0x724] ss:$16 sps:$4 sm:$0xff]  }
  0xa4   :  { %2049 = vmatpush1.bf16.msra.mxu0 %v3025_v62  ;;  %2179 = vmatprep.subr.bf16.mxu1 %v3032_v2  ;;  %v3112_v62 = vld [vmem:[#allocation5 + $0x308] ss:$16 sps:$4 sm:$0xff]   ;;  %v3115_v2 = vld [vmem:[#allocation5 + $0x720] ss:$16 sps:$4 sm:$0xff]  }
  0xa5   :  { %2051 = vmatprep.subr.bf16.mxu0 %v3029_v1  ;;  %v3116_v1 = vld [vmem:[#allocation5 + $0x32c] ss:$16 sps:$4 sm:$0xff]  }
  0xa7   :  { %2181 = vmatpush1.bf16.msra.mxu1 %v3034_v4  ;;  %v3119_v4 = vld [vmem:[#allocation5 + $0x744] ss:$16 sps:$4 sm:$0xff]  }
  0xa8   :  { %2053 = vmatpush1.bf16.msra.mxu0 %v3031_v3  ;;  %2183 = vmatprep.subr.bf16.mxu1 %v3038_v6  ;;  %v3118_v3 = vld [vmem:[#allocation5 + $0x328] ss:$16 sps:$4 sm:$0xff]   ;;  %v3121_v6 = vld [vmem:[#allocation5 + $0x740] ss:$16 sps:$4 sm:$0xff]  }
  0xa9   :  { %2055 = vmatprep.subr.bf16.mxu0 %v3035_v5  ;;  %v3122_v5 = vld [vmem:[#allocation5 + $0x34c] ss:$16 sps:$4 sm:$0xff]  }
  0xab   :  { %2185 = vmatpush1.bf16.msra.mxu1 %v3040_v8  ;;  %v3125_v8 = vld [vmem:[#allocation5 + $0x764] ss:$16 sps:$4 sm:$0xff]  }
  0xac   :  { %2057 = vmatpush1.bf16.msra.mxu0 %v3037_v7  ;;  %2187 = vmatprep.subr.bf16.mxu1 %v3044_v10  ;;  %v3124_v7 = vld [vmem:[#allocation5 + $0x348] ss:$16 sps:$4 sm:$0xff]   ;;  %v3127_v10 = vld [vmem:[#allocation5 + $0x760] ss:$16 sps:$4 sm:$0xff]  }
  0xad   :  { %2059 = vmatprep.subr.bf16.mxu0 %v3041_v9  ;;  %v3128_v9 = vld [vmem:[#allocation5 + $0x36c] ss:$16 sps:$4 sm:$0xff]  }
  0xaf   :  { %2189 = vmatpush1.bf16.msra.mxu1 %v3046_v12  ;;  %v3131_v12 = vld [vmem:[#allocation5 + $0x784] ss:$16 sps:$4 sm:$0xff]  }
  0xb0   :  { %2061 = vmatpush1.bf16.msra.mxu0 %v3043_v11  ;;  %2191 = vmatprep.subr.bf16.mxu1 %v3050_v14  ;;  %v3130_v11 = vld [vmem:[#allocation5 + $0x368] ss:$16 sps:$4 sm:$0xff]   ;;  %v3133_v14 = vld [vmem:[#allocation5 + $0x780] ss:$16 sps:$4 sm:$0xff]  }
  0xb1   :  { %2063 = vmatprep.subr.bf16.mxu0 %v3047_v13  ;;  %v3134_v13 = vld [vmem:[#allocation5 + $0x38c] ss:$16 sps:$4 sm:$0xff]  }
  0xb3   :  { %2193 = vmatpush1.bf16.msra.mxu1 %v3052_v16  ;;  %v3137_v16 = vld [vmem:[#allocation5 + $0x7a4] ss:$16 sps:$4 sm:$0xff]  }
  0xb4   :  { %2065 = vmatpush1.bf16.msra.mxu0 %v3049_v15  ;;  %2195 = vmatprep.subr.bf16.mxu1 %v3056_v18  ;;  %v3136_v15 = vld [vmem:[#allocation5 + $0x388] ss:$16 sps:$4 sm:$0xff]   ;;  %v3139_v18 = vld [vmem:[#allocation5 + $0x7a0] ss:$16 sps:$4 sm:$0xff]  }
  0xb5   :  { %2067 = vmatprep.subr.bf16.mxu0 %v3053_v17  ;;  %v3140_v17 = vld [vmem:[#allocation5 + $0x3ac] ss:$16 sps:$4 sm:$0xff]  }
  0xb7   :  { %2197 = vmatpush1.bf16.msra.mxu1 %v3058_v21  ;;  %v3146_v21 = vld [vmem:[#allocation5 + $0x3cc] ss:$16 sps:$4 sm:$0xff]  }
  0xb8   :  { %2069 = vmatpush1.bf16.msra.mxu0 %v3055_v20  ;;  %2199 = vmatprep.subr.bf16.mxu1 %v3062_v23  ;;  %v3143_v20 = vld [vmem:[#allocation5 + $0x7c4] ss:$16 sps:$4 sm:$0xff]   ;;  %v3148_v23 = vld [vmem:[#allocation5 + $0x3c8] ss:$16 sps:$4 sm:$0xff]  }
  0xb9   :  { %2071 = vmatprep.subr.bf16.mxu0 %v3059_v22  ;;  %v3145_v22 = vld [vmem:[#allocation5 + $0x7c0] ss:$16 sps:$4 sm:$0xff]  }
  0xba   :  { %1252 = vmatmul.mubr.f32.vlgmr.msra.gmra.mrb[2].mxu1 %v3515_v55  ;;  %v3080_v55 = vld [vmem:[#allocation5 + $0x26c] ss:$16 sps:$4 sm:$0xff]  }
  0xbb   :  { %1110 = vmatmul.mubr.f32.vlgmr.msra.gmra.mrb[0].mxu0 %v3533_v40  ;;  %2201 = vmatpush1.bf16.msra.mxu1 %v3064_v26  ;;  %v3152_v26 = vld [vmem:[#allocation5 + $0x3ec] ss:$16 sps:$4 sm:$0xff]  }
  0xbc   :  { %2073 = vmatpush1.bf16.msra.mxu0 %v3061_v25  ;;  %2203 = vmatprep.subr.bf16.mxu1 %v3068_v28  ;;  %v3149_v25 = vld [vmem:[#allocation5 + $0x7e4] ss:$16 sps:$4 sm:$0xff]   ;;  %v3154_v28 = vld [vmem:[#allocation5 + $0x3e8] ss:$16 sps:$4 sm:$0xff]  }
  0xbd   :  { %2075 = vmatprep.subr.bf16.mxu0 %v3065_v27  ;;  %1180 = vmatprep.mubr.f32.mxu0 %v3547_v29  ;;  %v3151_v27 = vld [vmem:[#allocation5 + $0x7e0] ss:$16 sps:$4 sm:$0xff]  }
  0xbe   :  { %1322 = vmatprep.mubr.f32.mxu1 %v3524_v63  ;;  %v3088_v63 = vld [vmem:[#allocation5 + $0x288] ss:$16 sps:$4 sm:$0xff]  }
  0xbf   :  { %2205 = vmatpush1.bf16.msra.mxu1 %v3070_v30  ;;  %v3158_v30 = vld [vmem:[#allocation5 + $0x408] ss:$16 sps:$4 sm:$0xff]  }
  0xc0   :  { %2077 = vmatpush1.bf16.msra.mxu0 %v3067_v50  ;;  %2207 = vmatprep.subr.bf16.mxu1 %v3074_v32  ;;  %v3156_v50 = vld [vmem:[#allocation5 + $0x40c] ss:$16 sps:$4 sm:$0xff]  }
  0xc1   :  { %2079 = vmatprep.subr.bf16.mxu0 %v3071_v31  ;;  %v3159_v31 = vld [vmem:[#allocation5 + $0x42c] ss:$16 sps:$4 sm:$0xff]  }
  0xc2   :  { %v3252_v32 = vld [vmem:[#allocation7 + $0x4] ss:$8 sps:$4 sm:$0xff]  }
  0xc3   :  { %2209 = vmatpush1.bf16.msra.mxu1 %v3076_v34  ;;  %v3255_v34 = vld [vmem:[#allocation7 + $0x14] ss:$8 sps:$4 sm:$0xff]  }
  0xc4   :  { %2081 = vmatpush1.bf16.msra.mxu0 %v3073_v33  ;;  %2211 = vmatprep.subr.bf16.mxu1 %v3080_v55  ;;  %v3254_v33 = vld [vmem:[#allocation7] ss:$8 sps:$4 sm:$0xff]   ;;  %v3162_v55 = vld [vmem:[#allocation5 + $0x44c] ss:$16 sps:$4 sm:$0xff]  }
  0xc5   :  { %2083 = vmatprep.subr.bf16.mxu0 %v3077_v35  ;;  %v3161_v35 = vld [vmem:[#allocation5 + $0x428] ss:$16 sps:$4 sm:$0xff]  }
  0xc7   :  { %2213 = vmatpush1.bf16.msra.mxu1 %v3082_v37  ;;  %v3258_v37 = vld [vmem:[#allocation7 + $0x24] ss:$8 sps:$4 sm:$0xff]  }
  0xc8   :  { %2085 = vmatpush1.bf16.msra.mxu0 %v3079_v36  ;;  %2215 = vmatprep.subr.bf16.mxu1 %v3086_v39  ;;  %v3257_v36 = vld [vmem:[#allocation7 + $0x10] ss:$8 sps:$4 sm:$0xff]   ;;  %v3165_v39 = vld [vmem:[#allocation5 + $0x46c] ss:$16 sps:$4 sm:$0xff]  }
  0xc9   :  { %2087 = vmatprep.subr.bf16.mxu0 %v3083_v38  ;;  %v3164_v38 = vld [vmem:[#allocation5 + $0x448] ss:$16 sps:$4 sm:$0xff]  }
  0xcb   :  { %2217 = vmatpush1.bf16.msra.mxu1 %v3088_v63  ;;  %v3167_v63 = vld [vmem:[#allocation5 + $0x468] ss:$16 sps:$4 sm:$0xff]  }
  0xcc   :  { %2089 = vmatpush1.bf16.msra.mxu0 %v3085_v41  ;;  %2219 = vmatprep.subr.bf16.mxu1 %v3092_v45  ;;  %v3261_v41 = vld [vmem:[#allocation7 + $0x34] ss:$8 sps:$4 sm:$0xff]   ;;  %v3264_v45 = vld [vmem:[#allocation7 + $0x44] ss:$8 sps:$4 sm:$0xff]  }
  0xcd   :  { %2091 = vmatprep.subr.bf16.mxu0 %v3089_v42  ;;  %v3168_v42 = vld [vmem:[#allocation5 + $0x48c] ss:$16 sps:$4 sm:$0xff]  }
  0xcf   :  { %2221 = vmatpush1.bf16.msra.mxu1 %v3094_v47  ;;  %v3171_v47 = vld [vmem:[#allocation5 + $0x4ac] ss:$16 sps:$4 sm:$0xff]  }
  0xd0   :  { %2093 = vmatpush1.bf16.msra.mxu0 %v3091_v46  ;;  %2223 = vmatprep.subr.bf16.mxu1 %v3098_v49  ;;  %v3170_v46 = vld [vmem:[#allocation5 + $0x488] ss:$16 sps:$4 sm:$0xff]   ;;  %v3267_v49 = vld [vmem:[#allocation7 + $0x54] ss:$8 sps:$4 sm:$0xff]  }
  0xd1   :  { %2095 = vmatprep.subr.bf16.mxu0 %v3095_v48  ;;  %v3266_v48 = vld [vmem:[#allocation7 + $0x40] ss:$8 sps:$4 sm:$0xff]  }
  0xd3   :  { %2225 = vmatpush1.bf16.msra.mxu1 %v3100_v52  ;;  %v3174_v52 = vld [vmem:[#allocation5 + $0x4cc] ss:$16 sps:$4 sm:$0xff]  }
  0xd4   :  { %2097 = vmatpush1.bf16.msra.mxu0 %v3097_v51  ;;  %2227 = vmatprep.subr.bf16.mxu1 %v3104_v54  ;;  %v3173_v51 = vld [vmem:[#allocation5 + $0x4a8] ss:$16 sps:$4 sm:$0xff]   ;;  %v3270_v54 = vld [vmem:[#allocation7 + $0x64] ss:$8 sps:$4 sm:$0xff]  }
  0xd5   :  { %2099 = vmatprep.subr.bf16.mxu0 %v3101_v53  ;;  %v3269_v53 = vld [vmem:[#allocation7 + $0x50] ss:$8 sps:$4 sm:$0xff]  }
  0xd7   :  { %2229 = vmatpush1.bf16.msra.mxu1 %v3106_v57  ;;  %v3177_v57 = vld [vmem:[#allocation5 + $0x4ec] ss:$16 sps:$4 sm:$0xff]  }
  0xd8   :  { %2101 = vmatpush1.bf16.msra.mxu0 %v3103_v56  ;;  %2231 = vmatprep.subr.bf16.mxu1 %v3110_v59  ;;  %v3176_v56 = vld [vmem:[#allocation5 + $0x4c8] ss:$16 sps:$4 sm:$0xff]   ;;  %v3273_v59 = vld [vmem:[#allocation7 + $0x74] ss:$8 sps:$4 sm:$0xff]  }
  0xd9   :  { %2103 = vmatprep.subr.bf16.mxu0 %v3107_v58  ;;  %v3272_v58 = vld [vmem:[#allocation7 + $0x60] ss:$8 sps:$4 sm:$0xff]  }
  0xdb   :  { %2233 = vmatpush1.bf16.msra.mxu1 %v3112_v62  ;;  %v3180_v62 = vld [vmem:[#allocation5 + $0x50c] ss:$16 sps:$4 sm:$0xff]  }
  0xdc   :  { %2105 = vmatpush1.bf16.msra.mxu0 %v3109_v60  ;;  %2235 = vmatprep.subr.bf16.mxu1 %v3116_v1  ;;  %v3179_v60 = vld [vmem:[#allocation5 + $0x4e8] ss:$16 sps:$4 sm:$0xff]   ;;  %v3276_v1 = vld [vmem:[#allocation7 + $0x84] ss:$8 sps:$4 sm:$0xff]  }
  0xdd   :  { %2107 = vmatprep.subr.bf16.mxu0 %v3113_v0  ;;  %v3275_v0 = vld [vmem:[#allocation7 + $0x70] ss:$8 sps:$4 sm:$0xff]  }
  0xdf   :  { %2237 = vmatpush1.bf16.msra.mxu1 %v3118_v3  ;;  %v3183_v3 = vld [vmem:[#allocation5 + $0x52c] ss:$16 sps:$4 sm:$0xff]  }
  0xe0   :  { %2109 = vmatpush1.bf16.msra.mxu0 %v3115_v2  ;;  %2239 = vmatprep.subr.bf16.mxu1 %v3122_v5  ;;  %v3182_v2 = vld [vmem:[#allocation5 + $0x508] ss:$16 sps:$4 sm:$0xff]   ;;  %v3279_v5 = vld [vmem:[#allocation7 + $0x94] ss:$8 sps:$4 sm:$0xff]  }
  0xe1   :  { %2111 = vmatprep.subr.bf16.mxu0 %v3119_v4  ;;  %v3278_v4 = vld [vmem:[#allocation7 + $0x80] ss:$8 sps:$4 sm:$0xff]  }
  0xe3   :  { %2241 = vmatpush1.bf16.msra.mxu1 %v3124_v7  ;;  %v3186_v7 = vld [vmem:[#allocation5 + $0x54c] ss:$16 sps:$4 sm:$0xff]  }
  0xe4   :  { %2113 = vmatpush1.bf16.msra.mxu0 %v3121_v6  ;;  %2243 = vmatprep.subr.bf16.mxu1 %v3128_v9  ;;  %v3185_v6 = vld [vmem:[#allocation5 + $0x528] ss:$16 sps:$4 sm:$0xff]   ;;  %v3282_v9 = vld [vmem:[#allocation7 + $0xa4] ss:$8 sps:$4 sm:$0xff]  }
  0xe5   :  { %2115 = vmatprep.subr.bf16.mxu0 %v3125_v8  ;;  %v3281_v8 = vld [vmem:[#allocation7 + $0x90] ss:$8 sps:$4 sm:$0xff]  }
  0xe7   :  { %2245 = vmatpush1.bf16.msra.mxu1 %v3130_v11  ;;  %v3189_v11 = vld [vmem:[#allocation5 + $0x56c] ss:$16 sps:$4 sm:$0xff]  }
  0xe8   :  { %2117 = vmatpush1.bf16.msra.mxu0 %v3127_v10  ;;  %2247 = vmatprep.subr.bf16.mxu1 %v3134_v13  ;;  %v3188_v10 = vld [vmem:[#allocation5 + $0x548] ss:$16 sps:$4 sm:$0xff]   ;;  %v3285_v13 = vld [vmem:[#allocation7 + $0xb4] ss:$8 sps:$4 sm:$0xff]  }
  0xe9   :  { %2119 = vmatprep.subr.bf16.mxu0 %v3131_v12  ;;  %v3284_v12 = vld [vmem:[#allocation7 + $0xa0] ss:$8 sps:$4 sm:$0xff]  }
  0xeb   :  { %2249 = vmatpush1.bf16.msra.mxu1 %v3136_v15  ;;  %v3192_v15 = vld [vmem:[#allocation5 + $0x58c] ss:$16 sps:$4 sm:$0xff]  }
  0xec   :  { %2121 = vmatpush1.bf16.msra.mxu0 %v3133_v14  ;;  %2251 = vmatprep.subr.bf16.mxu1 %v3140_v17  ;;  %v3191_v14 = vld [vmem:[#allocation5 + $0x568] ss:$16 sps:$4 sm:$0xff]   ;;  %v3288_v17 = vld [vmem:[#allocation7 + $0xc4] ss:$8 sps:$4 sm:$0xff]  }
  0xed   :  { %2123 = vmatprep.subr.bf16.mxu0 %v3137_v16  ;;  %v3287_v16 = vld [vmem:[#allocation7 + $0xb0] ss:$8 sps:$4 sm:$0xff]  }
  0xef   :  { %2253 = vmatpush1.bf16.msra.mxu1 %v3142_v19  ;;  %v3195_v19 = vld [vmem:[#allocation5 + $0x5ac] ss:$16 sps:$4 sm:$0xff]  }
  0xf0   :  { %2125 = vmatpush1.bf16.msra.mxu0 %v3139_v18  ;;  %2255 = vmatprep.subr.bf16.mxu1 %v3146_v21  ;;  %v3194_v18 = vld [vmem:[#allocation5 + $0x588] ss:$16 sps:$4 sm:$0xff]   ;;  %v3291_v21 = vld [vmem:[#allocation7 + $0xd4] ss:$8 sps:$4 sm:$0xff]  }
  0xf1   :  { %2127 = vmatprep.subr.bf16.mxu0 %v3143_v20  ;;  %v3290_v20 = vld [vmem:[#allocation7 + $0xc0] ss:$8 sps:$4 sm:$0xff]  }
  0xf3   :  { %2257 = vmatpush1.bf16.msra.mxu1 %v3148_v23  ;;  %v3198_v23 = vld [vmem:[#allocation5 + $0x5cc] ss:$16 sps:$4 sm:$0xff]  }
  0xf4   :  { %2129 = vmatpush1.bf16.msra.mxu0 %v3145_v22  ;;  %2259 = vmatprep.subr.bf16.mxu1 %v3152_v26  ;;  %v3197_v22 = vld [vmem:[#allocation5 + $0x5a8] ss:$16 sps:$4 sm:$0xff]  }
  0xf5   :  { %2131 = vmatprep.subr.bf16.mxu0 %v3149_v25  ;;  %v3293_v25 = vld [vmem:[#allocation7 + $0xd0] ss:$8 sps:$4 sm:$0xff]  }
  0xf6   :  { %v3200_v26 = vld [vmem:[#allocation5 + $0x5c8] ss:$16 sps:$4 sm:$0xff]  }
  0xf7   :  { %2261 = vmatpush1.bf16.msra.mxu1 %v3154_v28  ;;  %v3203_v28 = vld [vmem:[#allocation5 + $0x5e8] ss:$16 sps:$4 sm:$0xff]  }
  0xf8   :  { %2133 = vmatpush1.bf16.msra.mxu0 %v3151_v27  ;;  %2263 = vmatprep.subr.bf16.mxu1 %v3156_v50  ;;  %v3201_v27 = vld [vmem:[#allocation5 + $0x5ec] ss:$16 sps:$4 sm:$0xff]  }
  0xf9   :  { %2391 = vmatprep.subr.bf16.mxu0 %v3252_v32  ;;  %v3204_v50 = vld [vmem:[#allocation5 + $0x60c] ss:$16 sps:$4 sm:$0xff]   ;;  %v3209_v32 = vld [vmem:[#allocation5 + $0x628] ss:$16 sps:$4 sm:$0xff]  }
  0xfa   :  { %1323 = vmatmul.mubr.f32.vlgmr.msra.gmra.mrb[2].mxu1 %v3520_v61  ;;  %v3260_v61 = vld [vmem:[#allocation7 + $0x20] ss:$8 sps:$4 sm:$0xff]  }
  0xfb   :  { %1181 = vmatmul.mubr.f32.vlgmr.msra.gmra.mrb[0].mxu0 %v3543_v24  ;;  %2265 = vmatpush1.bf16.msra.mxu1 %v3158_v30  ;;  %v3206_v30 = vld [vmem:[#allocation5 + $0x608] ss:$16 sps:$4 sm:$0xff]  }
  0xfc   :  { %1393 = vmatprep.mubr.f32.mxu1 %v3537_v44  ;;  %2267 = vmatprep.subr.bf16.mxu1 %v3159_v31  ;;  %v3263_v44 = vld [vmem:[#allocation7 + $0x30] ss:$8 sps:$4 sm:$0xff]   ;;  %v3207_v31 = vld [vmem:[#allocation5 + $0x62c] ss:$16 sps:$4 sm:$0xff]  }
  0xfd   :  { %2393 = vmatpush1.bf16.msra.mxu0 %v3254_v33  ;;  %v3210_v33 = vld [vmem:[#allocation5 + $0x64c] ss:$16 sps:$4 sm:$0xff]  }
  0xfe   :  { %2395 = vmatprep.subr.bf16.mxu0 %v3255_v34  ;;  %v3212_v34 = vld [vmem:[#allocation5 + $0x648] ss:$16 sps:$4 sm:$0xff]  }
  0xff   :  { %2269 = vmatpush1.bf16.msra.mxu1 %v3161_v35  ;;  %v3213_v35 = vld [vmem:[#allocation5 + $0x66c] ss:$16 sps:$4 sm:$0xff]  }
 0x100   :  { %2271 = vmatprep.subr.bf16.mxu1 %v3162_v55  ;;  %v3215_v55 = vld [vmem:[#allocation5 + $0x668] ss:$16 sps:$4 sm:$0xff]  }
 0x101   :  { %2397 = vmatpush1.bf16.msra.mxu0 %v3257_v36  ;;  %v3216_v36 = vld [vmem:[#allocation5 + $0x68c] ss:$16 sps:$4 sm:$0xff]  }
 0x102   :  { %2399 = vmatprep.subr.bf16.mxu0 %v3258_v37  ;;  %v3218_v37 = vld [vmem:[#allocation5 + $0x688] ss:$16 sps:$4 sm:$0xff]  }
 0x103   :  { %2273 = vmatpush1.bf16.msra.mxu1 %v3164_v38  ;;  %v3219_v38 = vld [vmem:[#allocation5 + $0x6ac] ss:$16 sps:$4 sm:$0xff]  }
 0x104   :  { %2275 = vmatprep.subr.bf16.mxu1 %v3165_v39  ;;  %v3294_v39 = vld [vmem:[#allocation7 + $0xe4] ss:$8 sps:$4 sm:$0xff]  }
 0x105   :  { %2401 = vmatpush1.bf16.msra.mxu0 %v3260_v61  ;;  %v3222_v61 = vld [vmem:[#allocation5 + $0x6cc] ss:$16 sps:$4 sm:$0xff]  }
 0x106   :  { %2403 = vmatprep.subr.bf16.mxu0 %v3261_v41 }
 0x107   :  { %2277 = vmatpush1.bf16.msra.mxu1 %v3167_v63 }
 0x108   :  { %2279 = vmatprep.subr.bf16.mxu1 %v3168_v42  ;;  %v3224_v42 = vld [vmem:[#allocation5 + $0x6c8] ss:$16 sps:$4 sm:$0xff]  }
 0x109   :  { %2405 = vmatpush1.bf16.msra.mxu0 %v3263_v44  ;;  %v3297_v44 = vld [vmem:[#allocation7 + $0xf4] ss:$8 sps:$4 sm:$0xff]  }
 0x10a   :  { %2407 = vmatprep.subr.bf16.mxu0 %v3264_v45  ;;  %v3225_v45 = vld [vmem:[#allocation5 + $0x6ec] ss:$16 sps:$4 sm:$0xff]  }
 0x10b   :  { %2281 = vmatpush1.bf16.msra.mxu1 %v3170_v46  ;;  %v3299_v46 = vld [vmem:[#allocation7 + $0xf0] ss:$8 sps:$4 sm:$0xff]  }
 0x10c   :  { %2283 = vmatprep.subr.bf16.mxu1 %v3171_v47  ;;  %v3227_v47 = vld [vmem:[#allocation5 + $0x6e8] ss:$16 sps:$4 sm:$0xff]  }
 0x10d   :  { %2409 = vmatpush1.bf16.msra.mxu0 %v3266_v48  ;;  %v3228_v48 = vld [vmem:[#allocation5 + $0x70c] ss:$16 sps:$4 sm:$0xff]  }
 0x10e   :  { %2411 = vmatprep.subr.bf16.mxu0 %v3267_v49  ;;  %v3300_v49 = vld [vmem:[#allocation7 + $0x104] ss:$8 sps:$4 sm:$0xff]  }
 0x10f   :  { %2285 = vmatpush1.bf16.msra.mxu1 %v3173_v51  ;;  %v3230_v51 = vld [vmem:[#allocation5 + $0x708] ss:$16 sps:$4 sm:$0xff]  }
 0x110   :  { %2287 = vmatprep.subr.bf16.mxu1 %v3174_v52  ;;  %v3231_v52 = vld [vmem:[#allocation5 + $0x72c] ss:$16 sps:$4 sm:$0xff]  }
 0x111   :  { %2413 = vmatpush1.bf16.msra.mxu0 %v3269_v53  ;;  %v3233_v53 = vld [vmem:[#allocation5 + $0x728] ss:$16 sps:$4 sm:$0xff]  }
 0x112   :  { %2415 = vmatprep.subr.bf16.mxu0 %v3270_v54  ;;  %v3234_v54 = vld [vmem:[#allocation5 + $0x74c] ss:$16 sps:$4 sm:$0xff]  }
 0x113   :  { %2289 = vmatpush1.bf16.msra.mxu1 %v3176_v56  ;;  %v3236_v56 = vld [vmem:[#allocation5 + $0x748] ss:$16 sps:$4 sm:$0xff]  }
 0x114   :  { %2291 = vmatprep.subr.bf16.mxu1 %v3177_v57  ;;  %v3237_v57 = vld [vmem:[#allocation5 + $0x76c] ss:$16 sps:$4 sm:$0xff]  }
 0x115   :  { %2417 = vmatpush1.bf16.msra.mxu0 %v3272_v58  ;;  %v3239_v58 = vld [vmem:[#allocation5 + $0x768] ss:$16 sps:$4 sm:$0xff]  }
 0x116   :  { %2419 = vmatprep.subr.bf16.mxu0 %v3273_v59  ;;  %v3240_v59 = vld [vmem:[#allocation5 + $0x78c] ss:$16 sps:$4 sm:$0xff]  }
 0x117   :  { %2293 = vmatpush1.bf16.msra.mxu1 %v3179_v60  ;;  %v3242_v60 = vld [vmem:[#allocation5 + $0x788] ss:$16 sps:$4 sm:$0xff]  }
 0x118   :  { %2295 = vmatprep.subr.bf16.mxu1 %v3180_v62  ;;  %v3243_v62 = vld [vmem:[#allocation5 + $0x7ac] ss:$16 sps:$4 sm:$0xff]  }
 0x119   :  { %2421 = vmatpush1.bf16.msra.mxu0 %v3275_v0  ;;  %v3245_v0 = vld [vmem:[#allocation5 + $0x7a8] ss:$16 sps:$4 sm:$0xff]  }
 0x11a   :  { %2423 = vmatprep.subr.bf16.mxu0 %v3276_v1  ;;  %v3246_v1 = vld [vmem:[#allocation5 + $0x7cc] ss:$16 sps:$4 sm:$0xff]  }
 0x11b   :  { %2297 = vmatpush1.bf16.msra.mxu1 %v3182_v2  ;;  %v3248_v2 = vld [vmem:[#allocation5 + $0x7c8] ss:$16 sps:$4 sm:$0xff]  }
 0x11c   :  { %2299 = vmatprep.subr.bf16.mxu1 %v3183_v3  ;;  %v3249_v3 = vld [vmem:[#allocation5 + $0x7ec] ss:$16 sps:$4 sm:$0xff]  }
 0x11d   :  { %2425 = vmatpush1.bf16.msra.mxu0 %v3278_v4  ;;  %v3251_v4 = vld [vmem:[#allocation5 + $0x7e8] ss:$16 sps:$4 sm:$0xff]  }
 0x11e   :  { %2427 = vmatprep.subr.bf16.mxu0 %v3279_v5  ;;  %v3560_v5 = vsub.s32 0, %v3509_v43 }
 0x11f   :  { %2301 = vmatpush1.bf16.msra.mxu1 %v3185_v6  ;;  %v3565_v6 = vld [vmem:[%s3593_s2] sm:$0xf] }
 0x120   :  { %2303 = vmatprep.subr.bf16.mxu1 %v3186_v7  ;;  %v3568_v7 = vsub.s32 1, %v3509_v43 }
 0x121   :  { %2429 = vmatpush1.bf16.msra.mxu0 %v3281_v8  ;;  %v842_v8 = vrot.slane %v3565_v6, %v3560_v5 }
 0x122   :  { %2431 = vmatprep.subr.bf16.mxu0 %v3282_v9  ;;  %v846_v9 = vrot.slane %v3565_v6, %v3568_v7 }
 0x123   :  { %2305 = vmatpush1.bf16.msra.mxu1 %v3188_v10 }
 0x124   :  { %2307 = vmatprep.subr.bf16.mxu1 %v3189_v11 }
 0x125   :  { %2433 = vmatpush1.bf16.msra.mxu0 %v3284_v12 }
 0x126   :  { %2435 = vmatprep.subr.bf16.mxu0 %v3285_v13 }
 0x127   :  { %2309 = vmatpush1.bf16.msra.mxu1 %v3191_v14 }
 0x128   :  { %2311 = vmatprep.subr.bf16.mxu1 %v3192_v15 }
 0x129   :  { %2437 = vmatpush1.bf16.msra.mxu0 %v3287_v16 }
 0x12a   :  { %2439 = vmatprep.subr.bf16.mxu0 %v3288_v17  ;;  %v3302_v17 = vld [vmem:[#allocation7 + $0x100] ss:$8 sps:$4 sm:$0xff]  }
 0x12b   :  { %2313 = vmatpush1.bf16.msra.mxu1 %v3194_v18 }
 0x12c   :  { %2315 = vmatprep.subr.bf16.mxu1 %v3195_v19  ;;  %v3303_v19 = vld [vmem:[#allocation7 + $0x114] ss:$8 sps:$4 sm:$0xff]  }
 0x12d   :  { %2441 = vmatpush1.bf16.msra.mxu0 %v3290_v20 }
 0x12e   :  { %2443 = vmatprep.subr.bf16.mxu0 %v3291_v21  ;;  %v3305_v21 = vld [vmem:[#allocation7 + $0x110] ss:$8 sps:$4 sm:$0xff]  }
 0x12f   :  { %2317 = vmatpush1.bf16.msra.mxu1 %v3197_v22  ;;  %v3306_v22 = vld [vmem:[#allocation7 + $0x124] ss:$8 sps:$4 sm:$0xff]  }
 0x130   :  { %2319 = vmatprep.subr.bf16.mxu1 %v3198_v23  ;;  %v3308_v23 = vld [vmem:[#allocation7 + $0x120] ss:$8 sps:$4 sm:$0xff]  }
 0x131   :  { %2445 = vmatpush1.bf16.msra.mxu0 %v3293_v25  ;;  %v3309_v25 = vld [vmem:[#allocation7 + $0x134] ss:$8 sps:$4 sm:$0xff]  }
 0x132   :  { %2447 = vmatprep.subr.bf16.mxu0 %v3294_v39  ;;  %v3333_v39 = vld [vmem:[#allocation7 + $0x1b4] ss:$8 sps:$4 sm:$0xff]  }
 0x133   :  { %2321 = vmatpush1.bf16.msra.mxu1 %v3200_v26  ;;  %v3311_v26 = vld [vmem:[#allocation7 + $0x130] ss:$8 sps:$4 sm:$0xff]  }
 0x134   :  { %2323 = vmatprep.subr.bf16.mxu1 %v3201_v27  ;;  %v3312_v27 = vld [vmem:[#allocation7 + $0x144] ss:$8 sps:$4 sm:$0xff]  }
 0x137   :  { %2325 = vmatpush1.bf16.msra.mxu1 %v3203_v28  ;;  %v3314_v28 = vld [vmem:[#allocation7 + $0x140] ss:$8 sps:$4 sm:$0xff]  }
 0x138   :  { %2327 = vmatprep.subr.bf16.mxu1 %v3204_v50  ;;  %v3315_v50 = vld [vmem:[#allocation7 + $0x154] ss:$8 sps:$4 sm:$0xff]  }
 0x13a   :  { %1394 = vmatmul.mubr.f32.vlgmr.msra.gmra.mrb[2].mxu1 %v3533_v40  ;;  %v3221_v40 = vld [vmem:[#allocation5 + $0x6a8] ss:$16 sps:$4 sm:$0xff]  }
 0x13b   :  { %2329 = vmatpush1.bf16.msra.mxu1 %v3206_v30  ;;  %1464 = vmatprep.mubr.f32.mxu1 %v3547_v29  ;;  %v3296_v29 = vld [vmem:[#allocation7 + $0xe0] ss:$8 sps:$4 sm:$0xff]   ;;  %v3317_v30 = vld [vmem:[#allocation7 + $0x150] ss:$8 sps:$4 sm:$0xff]  }
 0x13c   :  { %2331 = vmatprep.subr.bf16.mxu1 %v3207_v31  ;;  %2449 = vmatpush1.bf16.msra.mxu0 %v3296_v29  ;;  %v3318_v31 = vld [vmem:[#allocation7 + $0x164] ss:$8 sps:$4 sm:$0xff]  }
 0x13d   :  { %2451 = vmatprep.subr.bf16.mxu0 %v3297_v44  ;;  %v3336_v29 = vld [vmem:[#allocation7 + $0x1c4] ss:$8 sps:$4 sm:$0xff]  }
 0x13e   :  { %v3342_v44 = vld [vmem:[#allocation7 + $0x1e4] ss:$8 sps:$4 sm:$0xff]  }
 0x13f   :  { %2333 = vmatpush1.bf16.msra.mxu1 %v3209_v32  ;;  %v3320_v32 = vld [vmem:[#allocation7 + $0x160] ss:$8 sps:$4 sm:$0xff]  }
 0x140   :  { %2335 = vmatprep.subr.bf16.mxu1 %v3210_v33  ;;  %2453 = vmatpush1.bf16.msra.mxu0 %v3299_v46  ;;  %v3321_v33 = vld [vmem:[#allocation7 + $0x174] ss:$8 sps:$4 sm:$0xff]  }
 0x141   :  { %2455 = vmatprep.subr.bf16.mxu0 %v3300_v49  ;;  %v3345_v46 = vld [vmem:[#allocation7 + $0x1f4] ss:$8 sps:$4 sm:$0xff]   ;;  %v853_v49 = vsub.s32 3, %v3509_v43 }
 0x143   :  { %2337 = vmatpush1.bf16.msra.mxu1 %v3212_v34  ;;  %v3323_v34 = vld [vmem:[#allocation7 + $0x170] ss:$8 sps:$4 sm:$0xff]  }
 0x144   :  { %2339 = vmatprep.subr.bf16.mxu1 %v3213_v35  ;;  %v3324_v35 = vld [vmem:[#allocation7 + $0x184] ss:$8 sps:$4 sm:$0xff]  }
 0x147   :  { %2341 = vmatpush1.bf16.msra.mxu1 %v3215_v55  ;;  %v3326_v55 = vld [vmem:[#allocation7 + $0x180] ss:$8 sps:$4 sm:$0xff]  }
 0x148   :  { %2343 = vmatprep.subr.bf16.mxu1 %v3216_v36  ;;  %v3327_v36 = vld [vmem:[#allocation7 + $0x194] ss:$8 sps:$4 sm:$0xff]  }
 0x14b   :  { %2345 = vmatpush1.bf16.msra.mxu1 %v3218_v37  ;;  %v3329_v37 = vld [vmem:[#allocation7 + $0x190] ss:$8 sps:$4 sm:$0xff]  }
 0x14c   :  { %2347 = vmatprep.subr.bf16.mxu1 %v3219_v38  ;;  %v3330_v38 = vld [vmem:[#allocation7 + $0x1a4] ss:$8 sps:$4 sm:$0xff]  }
 0x14d   :  { %v969_v41 = vpop.f32.mrb[0].mxu1 }
 0x14e   :  { %v971_v63 = vpop.f32.mrb[1].mxu1  ;;  %v970_v10 = vadd.f32 %v969_v41, %v842_v8  ;;  %v3338_v41 = vld [vmem:[#allocation7 + $0x1c0] ss:$8 sps:$4 sm:$0xff]  }
 0x14f   :  { %2349 = vmatpush1.bf16.msra.mxu1 %v3221_v40  ;;  %v972_v11 = vadd.f32 %v971_v63, %v846_v9  ;;  %v3332_v40 = vld [vmem:[#allocation7 + $0x1a0] ss:$8 sps:$4 sm:$0xff]   ;;  %v3339_v63 = vld [vmem:[#allocation7 + $0x1d4] ss:$8 sps:$4 sm:$0xff]  }
 0x150   :  { %2351 = vmatprep.subr.bf16.mxu1 %v3222_v61  ;;  %v3335_v61 = vld [vmem:[#allocation7 + $0x1b0] ss:$8 sps:$4 sm:$0xff]  }
 0x153   :  { %2353 = vmatpush1.bf16.msra.mxu1 %v3224_v42  ;;  %v3341_v42 = vld [vmem:[#allocation7 + $0x1d0] ss:$8 sps:$4 sm:$0xff]  }
 0x154   :  { %2355 = vmatprep.subr.bf16.mxu1 %v3225_v45  ;;  %v3344_v45 = vld [vmem:[#allocation7 + $0x1e0] ss:$8 sps:$4 sm:$0xff]  }
 0x157   :  { %2357 = vmatpush1.bf16.msra.mxu1 %v3227_v47  ;;  %v3347_v47 = vld [vmem:[#allocation7 + $0x1f0] ss:$8 sps:$4 sm:$0xff]  }
 0x158   :  { %2359 = vmatprep.subr.bf16.mxu1 %v3228_v48  ;;  %v849_v48 = vsub.s32 2, %v3509_v43  ;;  %v1675_v43 = vld [vmem:[%s3595_s4] sm:$0x3] }
 0x15b   :  { %2361 = vmatpush1.bf16.msra.mxu1 %v3230_v51  ;;  %v850_v51 = vrot.slane %v3565_v6, %v849_v48 }
 0x15c   :  { %2363 = vmatprep.subr.bf16.mxu1 %v3231_v52  ;;  %v854_v52 = vrot.slane %v3565_v6, %v853_v49 }
 0x15f   :  { %2365 = vmatpush1.bf16.msra.mxu1 %v3233_v53 }
 0x160   :  { %2367 = vmatprep.subr.bf16.mxu1 %v3234_v54 }
 0x163   :  { %2369 = vmatpush1.bf16.msra.mxu1 %v3236_v56 }
 0x164   :  { %2371 = vmatprep.subr.bf16.mxu1 %v3237_v57 }
 0x167   :  { %2373 = vmatpush1.bf16.msra.mxu1 %v3239_v58 }
 0x168   :  { %2375 = vmatprep.subr.bf16.mxu1 %v3240_v59 }
 0x16b   :  { %2377 = vmatpush1.bf16.msra.mxu1 %v3242_v60 }
 0x16c   :  { %2379 = vmatprep.subr.bf16.mxu1 %v3243_v62 }
 0x16f   :  { %2381 = vmatpush1.bf16.msra.mxu1 %v3245_v0  ;;  %v1680_v0 = vrot.slane %v1675_v43, %v3560_v5 }
 0x170   :  { %2383 = vmatprep.subr.bf16.mxu1 %v3246_v1  ;;  %v1684_v1 = vrot.slane %v1675_v43, %v3568_v7 }
 0x173   :  { %2385 = vmatpush1.bf16.msra.mxu1 %v3248_v2  ;;  %v1835_v2 = vld [vmem:[%s3596_s5] sm:$0x3] }
 0x174   :  { %2387 = vmatprep.subr.bf16.mxu1 %v3249_v3  ;;  %v1840_v9 = vrot.slane %v1835_v2, %v3560_v5 }
 0x177   :  { %2389 = vmatpush1.bf16.msra.mxu1 %v3251_v4 }
 0x17a   :  { %1465 = vmatmul.mubr.f32.vlgmr.msra.gmra.mrb[2].mxu1 %v3543_v24 }
 0x1ce   :  { %v1182_v24 = vpop.f32.mrb[0].mxu0 }
 0x1cf   :  { %v2519_v12 = vadd.f32 %v1182_v24, %v970_v10  ;;  %v1184_v13 = vpop.f32.mrb[1].mxu0 }
 0x1d0   :  { %v2521_v14 = vadd.f32 %v1184_v13, %v972_v11  ;;  %v1844_v11 = vrot.slane %v1835_v2, %v3568_v7 }
 0x1d1   :  { %v1475_v15 = vmul.f32 0.2, %v2519_v12  ;;  %vm1471_vm0 = vcmp.ge.f32.partialorder %v2519_v12, 0.0 }
 0x1d2   :  { %v1476_v16 = vmul.f32 0.2, %v2521_v14  ;;  %vm1472_vm1 = vcmp.ge.f32.partialorder %v2521_v14, 0.0 }
 0x1d3   :  { %v1479_v20 = vsel %vm1471_vm0, %v2519_v12, %v1475_v15 }
 0x1d4   :  { %v1480_v18 = vsel %vm1472_vm1, %v2521_v14, %v1476_v16 }
 0x1d5   :  { %1751 = vmatprep.mubr.f32.mxu0 %v1480_v18 }
 0x1d6   :  { %1752 = vmatmul.mubr.f32.vlgmr.msra.gmra.mrb[2].mxu0 %v1479_v20 }
 0x1d7   :  { %2457 = vmatpush1.bf16.msra.mxu0 %v3302_v17 }
 0x1d8   :  { %2459 = vmatprep.subr.bf16.mxu0 %v3303_v19  ;;  %v1877_v19 = vld [vmem:[#allocation2] ss:$0 sm:$0xff] }
 0x1db   :  { %2461 = vmatpush1.bf16.msra.mxu0 %v3305_v21 }
 0x1dc   :  { %2463 = vmatprep.subr.bf16.mxu0 %v3306_v22 }
 0x1df   :  { %2465 = vmatpush1.bf16.msra.mxu0 %v3308_v23 }
 0x1e0   :  { %2467 = vmatprep.subr.bf16.mxu0 %v3309_v25 }
 0x1e3   :  { %2469 = vmatpush1.bf16.msra.mxu0 %v3311_v26 }
 0x1e4   :  { %2471 = vmatprep.subr.bf16.mxu0 %v3312_v27 }
 0x1e7   :  { %2473 = vmatpush1.bf16.msra.mxu0 %v3314_v28 }
 0x1e8   :  { %2475 = vmatprep.subr.bf16.mxu0 %v3315_v50 }
 0x1eb   :  { %2477 = vmatpush1.bf16.msra.mxu0 %v3317_v30 }
 0x1ec   :  { %2479 = vmatprep.subr.bf16.mxu0 %v3318_v31 }
 0x1ef   :  { %2481 = vmatpush1.bf16.msra.mxu0 %v3320_v32 }
 0x1f0   :  { %2483 = vmatprep.subr.bf16.mxu0 %v3321_v33 }
 0x1f3   :  { %2485 = vmatpush1.bf16.msra.mxu0 %v3323_v34 }
 0x1f4   :  { %2487 = vmatprep.subr.bf16.mxu0 %v3324_v35 }
 0x1f7   :  { %2489 = vmatpush1.bf16.msra.mxu0 %v3326_v55 }
 0x1f8   :  { %2491 = vmatprep.subr.bf16.mxu0 %v3327_v36 }
 0x1fb   :  { %2493 = vmatpush1.bf16.msra.mxu0 %v3329_v37 }
 0x1fc   :  { %2495 = vmatprep.subr.bf16.mxu0 %v3330_v38 }
 0x1ff   :  { %2497 = vmatpush1.bf16.msra.mxu0 %v3332_v40 }
 0x200   :  { %2499 = vmatprep.subr.bf16.mxu0 %v3333_v39 }
 0x203   :  { %2501 = vmatpush1.bf16.msra.mxu0 %v3335_v61 }
 0x204   :  { %2503 = vmatprep.subr.bf16.mxu0 %v3336_v29 }
 0x207   :  { %2505 = vmatpush1.bf16.msra.mxu0 %v3338_v41 }
 0x208   :  { %2507 = vmatprep.subr.bf16.mxu0 %v3339_v63 }
 0x20b   :  { %2509 = vmatpush1.bf16.msra.mxu0 %v3341_v42 }
 0x20c   :  { %2511 = vmatprep.subr.bf16.mxu0 %v3342_v44 }
 0x20f   :  { %2513 = vmatpush1.bf16.msra.mxu0 %v3344_v45 }
 0x210   :  { %2515 = vmatprep.subr.bf16.mxu0 %v3345_v46 }
 0x213   :  { %2517 = vmatpush1.bf16.msra.mxu0 %v3347_v47 }
 0x24d   :  { %v1466_v53 = vpop.f32.mrb[2].mxu1 }
 0x24e   :  { %v2522_v54 = vadd.f32 %v1466_v53, %v850_v51  ;;  %v1468_v56 = vpop.f32.mrb[3].mxu1 }
 0x24f   :  { %v2523_v57 = vadd.f32 %v1468_v56, %v854_v52 }
 0x250   :  { %v1477_v58 = vmul.f32 0.2, %v2522_v54  ;;  %vm1473_vm2 = vcmp.ge.f32.partialorder %v2522_v54, 0.0 }
 0x251   :  { %v1478_v59 = vmul.f32 0.2, %v2523_v57  ;;  %vm1474_vm3 = vcmp.ge.f32.partialorder %v2523_v57, 0.0 }
 0x252   :  { %v1481_v62 = vsel %vm1473_vm2, %v2522_v54, %v1477_v58 }
 0x253   :  { %v1482_v60 = vsel %vm1474_vm3, %v2523_v57, %v1478_v59 }
 0x254   :  { %1822 = vmatprep.mubr.f32.mxu0 %v1482_v60 }
 0x255   :  { %1823 = vmatmul.mubr.f32.vlgmr.msra.gmra.mrb[2].mxu0 %v1481_v62 }
 0x328   :  { %v1824_v3 = vpop.f32.mrb[2].mxu0 }
 0x329   :  { %v2524_v4 = vadd.f32 %v1824_v3, %v1680_v0  ;;  %v1826_v6 = vpop.f32.mrb[3].mxu0 }
 0x32a   :  { %v2525_v8 = vadd.f32 %v1826_v6, %v1684_v1 }
 0x32b   :  { %vm1829_vm4 = vcmp.ge.f32.partialorder %v2524_v4, 0.0  ;;  %v1831_v10 = vmul.f32 0.2, %v2524_v4 }
 0x32c   :  { %vm1830_vm5 = vcmp.ge.f32.partialorder %v2525_v8, 0.0  ;;  %v1832_v24 = vmul.f32 0.2, %v2525_v8 }
 0x32d   :  { %v1833_v12 = vsel %vm1829_vm4, %v2524_v4, %v1831_v10 }
 0x32e   :  { %v1834_v13 = vsel %vm1830_vm5, %v2525_v8, %v1832_v24  ;;  %v1847_v14 = vmul.f32 %v1840_v9, %v1833_v12 }
 0x32f   :  { %v1848_v15 = vmul.f32 %v1844_v11, %v1834_v13 }
 0x330   :  { %v1850_v16 = vsel %vm1849_vm6, %v1847_v14, 0.0 }
 0x331   :  { %v1851_v17 = vsel %vm1849_vm6, %v1848_v15, 0.0 }
 0x332   :  { %v1852_v18 = vadd.f32 %v1851_v17, %v1850_v16 }
 0x334   :  { %1853 = vadd.xlane.f32.xlu0 %v1852_v18 }
 0x3c1   :  { %v1854_v20 = vpop.xlane.xlu0 %1853 }
 0x3c2   :  { %v1862_v21 = vadd.f32 %v1877_v19, %v1854_v20 }
 0x3c4   :  { %v1863_v22 = vsub.f32 0.0, %v1862_v21 }
 0x3c6   :  { %v1864_v5 = vmul.f32 1.442695, %v1863_v22 }
 0x3c8   :  { %3348 = vpow2.f32 %v1864_v5 }
 0x3d2   :  { %v3349_v23 = vpop.eup %3348 }
 0x3d3   :  { %v1866_v25 = vadd.f32 1.0, %v3349_v23 }
 0x3d5   :  { %3350 = vrcp.f32 %v1866_v25 }
 0x3df   :  { %v3351_v7 = vpop.eup %3350 }
 0x3e0   :  { %1870 = vst.msk [vmem:[%s3598_s7] sm:$0x3] %vm1869_vm7, %v3351_v7 }
 0x3e1   :  { %1875 = vsyncpa [#allocation4], 1 }
 0x3e2   :  { %1876 = vsyncpa [#allocation6], 1 }

</bundles_post_ra>
